<compile_context>
chip_gen: v7x
topology: tpu7x:2x2x1
jax: 0.10.0
libtpu: 0.0.40
codegen_flags: <defaults>
</compile_context>

<pallas_src>
import functools
import math

import jax
import jax.numpy as jnp
from jax.experimental import pallas as pl
from jax.experimental.pallas import tpu as pltpu


# ----------------------------- in-kernel helpers -----------------------------

def _layer_norm(x, w, b, eps=1e-5):
    mu = jnp.mean(x, axis=-1, keepdims=True)
    var = jnp.mean((x - mu) ** 2, axis=-1, keepdims=True)
    return (x - mu) * jax.lax.rsqrt(var + eps) * w + b


def _gelu(x):
    # tanh-approximate GELU (EUP-friendly). PyTorch nn.GELU default is the
    # exact erf form -> expect ~1e-3 drift; the reference MLP is unspecified.
    c = math.sqrt(2.0 / math.pi)
    return 0.5 * x * (1.0 + jnp.tanh(c * (x + 0.044715 * x * x * x)))


# ------------------------------ fused ViT kernel ------------------------------

def fused_vit_kernel(x_ref, ln1w_ref, ln1b_ref, wqkv_ref, bqkv_ref,
                     wproj_ref, bproj_ref, ln2w_ref, ln2b_ref,
                     w1_ref, b1_ref, w2_ref, b2_ref,
                     normw_ref, normb_ref, headw_ref, headb_ref,
                     logits_ref, xbuf_ref, attn_ref, *,
                     num_heads, bt, sp, s_valid):
    layer = pl.program_id(1)
    n_layers = pl.num_programs(1)

    D = xbuf_ref.shape[1]
    Dh = D // num_heads
    # Head grouping: make every qkv slice / attn_ref store a lane-dense slab of
    # up to 128 lanes (e.g. pairs of heads when Dh == 64 as in ViT-Base).
    if Dh < 128:
        gh = min(num_heads, max(1, 128 // Dh))
        while num_heads % gh:
            gh -= 1
    else:
        gh = 1
    gw = gh * Dh
    n_groups = num_heads // gh

    # Load the token block into the resident VMEM activation slab once per
    # batch tile (first layer step only).
    @pl.when(layer == 0)
    def _():
        for s in range(bt):
            xbuf_ref[s * sp:(s + 1) * sp, :] = x_ref[s].astype(jnp.float32)

    x = xbuf_ref[...]                       # (Bt*Sp, D) f32 residual stream

    # Additive mask for padded key positions (sequence was padded to Sp rows).
    key_mask = jnp.where(
        jax.lax.broadcasted_iota(jnp.int32, (1, sp), 1) >= s_valid,
        jnp.float32(-1e30), jnp.float32(0.0))

    # ---------------- MHSA (pre-norm) ----------------
    h = _layer_norm(x, ln1w_ref[0], ln1b_ref[0])                       # (Bt*Sp, D)
    # Single bf16 cast of the whole qkv intermediate (perf review item).
    qkv = (jnp.dot(h.astype(jnp.bfloat16), wqkv_ref[0],
                   preferred_element_type=jnp.float32)
           + bqkv_ref[0]).astype(jnp.bfloat16)                          # (Bt*Sp, 3D)

    # Per-sample, per-head attention (static unroll; Bt and num_heads are small).
    # TODO(synk): if num_heads*Bt unroll ever spills vregs (bundle dump), switch
    #             to lax.fori_loop(..., unroll=True) over head groups.
    for s in range(bt):
        base = s * sp
        for g in range(n_groups):
            parts = []
            for hh in range(gh):
                hd = g * gh + hh
                qh = qkv[base:base + sp, hd * Dh:(hd + 1) * Dh]
                kh = qkv[base:base + sp, D + hd * Dh:D + (hd + 1) * Dh]
                vh = qkv[base:base + sp, 2 * D + hd * Dh:2 * D + (hd + 1) * Dh]
                # q @ k^T (contract last dims); 1/sqrt(Dh) is folded into W_q.
                sc = jax.lax.dot_general(qh, kh, (((1,), (1,)), ((), ())),
                                         preferred_element_type=jnp.float32)
                sc = sc + key_mask                      # mask padded keys
                sc = sc - jnp.max(sc, axis=-1, keepdims=True)
                p = jnp.exp(sc)
                p = p * pl.reciprocal(jnp.sum(p, axis=-1, keepdims=True),
                                      approx=True)
                ctx = jnp.dot(p.astype(jnp.bfloat16), vh,
                              preferred_element_type=jnp.float32)       # (Sp, Dh)
                parts.append(ctx.astype(jnp.bfloat16))
            grp = parts[0] if gh == 1 else jnp.concatenate(parts, axis=-1)
            attn_ref[base:base + sp, g * gw:(g + 1) * gw] = grp         # bf16 slab

    attn = jnp.dot(attn_ref[...], wproj_ref[0],
                   preferred_element_type=jnp.float32) + bproj_ref[0]   # (Bt*Sp, D)
    x = x + attn

    # ---------------- MLP (pre-norm) ----------------
    h = _layer_norm(x, ln2w_ref[0], ln2b_ref[0])
    h = jnp.dot(h.astype(jnp.bfloat16), w1_ref[0],
                preferred_element_type=jnp.float32) + b1_ref[0]         # (Bt*Sp, Dm)
    h = _gelu(h)
    h = jnp.dot(h.astype(jnp.bfloat16), w2_ref[0],
                preferred_element_type=jnp.float32) + b2_ref[0]         # (Bt*Sp, D)
    x = x + h

    xbuf_ref[...] = x                       # carry activations to next layer

    # -------- final LayerNorm + classification head (fused, last layer) -------
    @pl.when(layer == n_layers - 1)
    def _():
        cls = jnp.concatenate([x[s * sp:s * sp + 1, :] for s in range(bt)], axis=0)
        hc = _layer_norm(cls, normw_ref[...], normb_ref[...])           # (Bt, D)
        logits = jnp.dot(hc.astype(jnp.bfloat16), headw_ref[...],
                         preferred_element_type=jnp.float32) + headb_ref[...]
        logits_ref[0] = logits.astype(logits_ref.dtype)                 # (Bt, Cp)


# --------------------------------- full model ---------------------------------

def _round_up(v, m):
    return ((v + m - 1) // m) * m


def _pick_vmem_limit():
    # Per-generation VMEM budget (perf review): ~3/4 of physical capacity,
    # i.e. ~96 MiB on v5e/v6e (128 MiB) and ~48 MiB on v7x (64 MiB / TC).
    try:
        cap = int(getattr(pltpu.get_tpu_info(), "vmem_capacity_bytes", 0))
        if cap > 0:
            return (cap * 3) // 4
    except Exception:
        pass
    return 48 * 1024 * 1024


def downstream_vit_forward(params, x, coords, sizes, *, num_heads, num_classes,
                           batch_tile=8, weight_buffers=None):
    # coords / sizes are accepted (as in the PyTorch forward) but unused there.
    del coords, sizes
    B, N, D = x.shape
    S = N + 1
    depth = params["w_qkv"].shape[0]
    Dm = params["w1"].shape[2]
    Cp = params["head_w"].shape[1]          # lane-padded number of classes

    Sp = _round_up(S, 16)                   # sublane-aligned sequence length
    Bt = max(1, min(batch_tile, B))         # samples per grid step (amortize weight DMA)
    Bpad = _round_up(B, Bt)
    n_btiles = Bpad // Bt

    cls = jnp.broadcast_to(params["cls_token"], (B, 1, D)).astype(x.dtype)
    xs = jnp.concatenate([cls, x], axis=1) + params["pos_embed"]       # (B, S, D)
    # pos_drop: identity in eval mode. Zero-pad batch (grid tiling) and sequence
    # (sublane alignment); padded key rows are masked in the kernel softmax.
    xs = jnp.pad(xs, ((0, Bpad - B), (0, Sp - S), (0, 0)))

    def rep2(shape):          # constant (replicated) 2-D param
        return pl.BlockSpec(shape, lambda b, l: (0, 0))

    def per_layer3(shape, buffers=None):    # (depth, ...) stacked, indexed by layer
        if buffers is None:
            return pl.BlockSpec(shape, lambda b, l: (l, 0, 0))
        # Optional deeper buffering for the longest weight DMAs (v6e tuning).
        return pl.BlockSpec(shape, lambda b, l: (l, 0, 0),
                            pipeline_mode=pl.Buffered(int(buffers)))

    in_specs = [
        pl.BlockSpec((Bt, Sp, D), lambda b, l: (b, 0, 0)),   # tokens
        per_layer3((1, 1, D)), per_layer3((1, 1, D)),        # ln1 w, b
        per_layer3((1, D, 3 * D), weight_buffers),           # qkv w
        per_layer3((1, 1, 3 * D)),                           # qkv b
        per_layer3((1, D, D)), per_layer3((1, 1, D)),        # proj w, b
        per_layer3((1, 1, D)), per_layer3((1, 1, D)),        # ln2 w, b
        per_layer3((1, D, Dm), weight_buffers),              # fc1 w
        per_layer3((1, 1, Dm)),                              # fc1 b
        per_layer3((1, Dm, D), weight_buffers),              # fc2 w
        per_layer3((1, 1, D)),                               # fc2 b
        rep2((1, D)), rep2((1, D)),                          # final norm w, b
        rep2((D, Cp)), rep2((1, Cp)),                        # head w, b (padded)
    ]

    weight_bytes = sum(int(params[k].nbytes) for k in
                       ("ln1_w", "ln1_b", "w_qkv", "b_qkv", "w_proj", "b_proj",
                        "ln2_w", "ln2_b", "w1", "b1", "w2", "b2",
                        "norm_w", "norm_b", "head_w", "head_b"))
    cost = pl.CostEstimate(
        flops=int(Bpad * depth * (8 * Sp * D * D + 4 * Sp * Sp * D
                                  + 4 * Sp * D * Dm) + 2 * Bpad * D * Cp),
        transcendentals=int(Bpad * depth * (num_heads * Sp * Sp + Sp * Dm)),
        bytes_accessed=int(weight_bytes * n_btiles + xs.nbytes + Bpad * Cp * 4))

    logits_pad = pl.pallas_call(
        functools.partial(fused_vit_kernel, num_heads=num_heads,
                          bt=Bt, sp=Sp, s_valid=S),
        grid=(n_btiles, depth),
        in_specs=in_specs,
        out_specs=pl.BlockSpec((1, Bt, Cp), lambda b, l: (b, 0, 0)),
        out_shape=jax.ShapeDtypeStruct((n_btiles, Bt, Cp), jnp.float32),
        scratch_shapes=[pltpu.VMEM((Bt * Sp, D), jnp.float32),    # resident activations
                        pltpu.VMEM((Bt * Sp, D), jnp.bfloat16)],  # per-layer attn ctx
        compiler_params=pltpu.CompilerParams(
            dimension_semantics=("parallel", "arbitrary"),
            vmem_limit_bytes=_pick_vmem_limit()),
        cost_estimate=cost,
    )(xs,
      params["ln1_w"], params["ln1_b"], params["w_qkv"], params["b_qkv"],
      params["w_proj"], params["b_proj"], params["ln2_w"], params["ln2_b"],
      params["w1"], params["b1"], params["w2"], params["b2"],
      params["norm_w"], params["norm_b"], params["head_w"], params["head_b"])

    return logits_pad.reshape(Bpad, Cp)[:B, :num_classes]        # (B, num_classes)


# ---------------------------- deterministic init -------------------------------

def _xavier_uniform(key, fan_in, fan_out):
    bound = math.sqrt(6.0 / (fan_in + fan_out))
    # stored as (in, out) so the kernel computes x @ W
    return jax.random.uniform(key, (fan_in, fan_out), jnp.float32, -bound, bound)


def _stacked_xavier(key, n, fan_in, fan_out):
    keys = jax.random.split(key, n)
    return jnp.stack([_xavier_uniform(k, fan_in, fan_out) for k in keys])


def init_params(key, *, num_tokens, embed_dim, depth, num_heads, num_classes,
                mlp_ratio):
    D = embed_dim
    Dm = int(D * mlp_ratio)
    Cp = _round_up(num_classes, 128)          # lane-dense head output
    scale = 1.0 / math.sqrt(D // num_heads)

    key, k_qkv, k_proj, k_fc1, k_fc2, k_head = jax.random.split(key, 6)
    head_w = jnp.zeros((D, Cp), jnp.float32).at[:, :num_classes].set(
        _xavier_uniform(k_head, D, num_classes))

    # Fold the 1/sqrt(Dh) attention scale into the Q columns of the QKV weight
    # (perf review): removes the (S,S) score scaling per head per layer.
    # (The Q bias is zero-init so no bias fold is needed.)
    w_qkv = _stacked_xavier(k_qkv, depth, D, 3 * D)
    w_qkv = w_qkv.at[:, :, :D].multiply(scale)

    return {
        "cls_token": jnp.zeros((1, 1, D), jnp.float32),                # torch.zeros
        "pos_embed": jnp.zeros((1, num_tokens + 1, D), jnp.float32),   # torch.zeros
        # per-layer params stacked over depth; matmul weights shipped as bf16
        "ln1_w": jnp.ones((depth, 1, D), jnp.float32),
        "ln1_b": jnp.zeros((depth, 1, D), jnp.float32),
        "w_qkv": w_qkv.astype(jnp.bfloat16),
        "b_qkv": jnp.zeros((depth, 1, 3 * D), jnp.float32),
        "w_proj": _stacked_xavier(k_proj, depth, D, D).astype(jnp.bfloat16),
        "b_proj": jnp.zeros((depth, 1, D), jnp.float32),
        "ln2_w": jnp.ones((depth, 1, D), jnp.float32),
        "ln2_b": jnp.zeros((depth, 1, D), jnp.float32),
        "w1": _stacked_xavier(k_fc1, depth, D, Dm).astype(jnp.bfloat16),
        "b1": jnp.zeros((depth, 1, Dm), jnp.float32),
        "w2": _stacked_xavier(k_fc2, depth, Dm, D).astype(jnp.bfloat16),
        "b2": jnp.zeros((depth, 1, D), jnp.float32),
        # final norm + padded head
        "norm_w": jnp.ones((1, D), jnp.float32),
        "norm_b": jnp.zeros((1, D), jnp.float32),
        "head_w": head_w.astype(jnp.bfloat16),
        "head_b": jnp.zeros((1, Cp), jnp.float32),
    }


# ------------------------------------ main -------------------------------------

if __name__ == "__main__":
    B, num_tokens, embed_dim = 2, 8, 32
    depth, num_heads, num_classes = 2, 4, 10
    mlp_ratio = 4.0

    root = jax.random.PRNGKey(0)
    kx, kp = jax.random.split(root)

    params = init_params(kp, num_tokens=num_tokens, embed_dim=embed_dim,
                         depth=depth, num_heads=num_heads,
                         num_classes=num_classes, mlp_ratio=mlp_ratio)

    # TODO(synk): the HierarchicalViTEncoder / leaf-patch resize + leaf_embedder
    # front-end of AdaptiveFocusViT is not provided; the classifier consumes
    # pre-embedded tokens directly (as DownstreamViTClassifier.forward does).
    x = jax.random.normal(kx, (B, num_tokens, embed_dim), jnp.float32)
    coords = jnp.zeros((B, num_tokens, 2), jnp.float32)   # unused by forward
    sizes = jnp.ones((B, num_tokens, 2), jnp.float32)     # unused by forward

    out = downstream_vit_forward(params, x, coords, sizes,
                                 num_heads=num_heads, num_classes=num_classes)
    out = jax.block_until_ready(out)
    assert out.shape == (B, num_classes) and out.dtype == jnp.float32
    print("KERNEL_OK")
</pallas_src>

<mosaic_0001>
module attributes {stable_mosaic.version = 11 : i64} {
  func.func @fused_vit_kernel(%arg0: i32, %arg1: i32, %arg2: memref<2x16x32xf32, #tpu.memory_space<vmem>>, %arg3: memref<1x1x32xf32, #tpu.memory_space<vmem>>, %arg4: memref<1x1x32xf32, #tpu.memory_space<vmem>>, %arg5: memref<1x32x96xbf16, #tpu.memory_space<vmem>>, %arg6: memref<1x1x96xf32, #tpu.memory_space<vmem>>, %arg7: memref<1x32x32xbf16, #tpu.memory_space<vmem>>, %arg8: memref<1x1x32xf32, #tpu.memory_space<vmem>>, %arg9: memref<1x1x32xf32, #tpu.memory_space<vmem>>, %arg10: memref<1x1x32xf32, #tpu.memory_space<vmem>>, %arg11: memref<1x32x128xbf16, #tpu.memory_space<vmem>>, %arg12: memref<1x1x128xf32, #tpu.memory_space<vmem>>, %arg13: memref<1x128x32xbf16, #tpu.memory_space<vmem>>, %arg14: memref<1x1x32xf32, #tpu.memory_space<vmem>>, %arg15: memref<1x32xf32, #tpu.memory_space<vmem>>, %arg16: memref<1x32xf32, #tpu.memory_space<vmem>>, %arg17: memref<32x128xbf16, #tpu.memory_space<vmem>>, %arg18: memref<1x128xf32, #tpu.memory_space<vmem>>, %arg19: memref<1x2x128xf32, #tpu.memory_space<vmem>>, %arg20: memref<32x32xf32, #tpu.memory_space<vmem>>, %arg21: memref<32x32xbf16, #tpu.memory_space<vmem>>) attributes {dimension_semantics = [#tpu.dimension_semantics<parallel>, #tpu.dimension_semantics<arbitrary>], iteration_bounds = array<i64: 1, 2>, scalar_prefetch = 0 : i64, scratch_operands = 2 : i64, tpu.core_type = #tpu.core_type<tc>, window_params = [{transform_indices = @transform_0, window_bounds = array<i64: 2, 16, 32>}, {transform_indices = @transform_1, window_bounds = array<i64: 1, 1, 32>}, {transform_indices = @transform_2, window_bounds = array<i64: 1, 1, 32>}, {transform_indices = @transform_3, window_bounds = array<i64: 1, 32, 96>}, {transform_indices = @transform_4, window_bounds = array<i64: 1, 1, 96>}, {transform_indices = @transform_5, window_bounds = array<i64: 1, 32, 32>}, {transform_indices = @transform_6, window_bounds = array<i64: 1, 1, 32>}, {transform_indices = @transform_7, window_bounds = array<i64: 1, 1, 32>}, {transform_indices = @transform_8, window_bounds = array<i64: 1, 1, 32>}, {transform_indices = @transform_9, window_bounds = array<i64: 1, 32, 128>}, {transform_indices = @transform_10, window_bounds = array<i64: 1, 1, 128>}, {transform_indices = @transform_11, window_bounds = array<i64: 1, 128, 32>}, {transform_indices = @transform_12, window_bounds = array<i64: 1, 1, 32>}, {pipeline_mode = #tpu.pipeline_mode<synchronous>, transform_indices = @transform_13, window_bounds = array<i64: 1, 32>}, {pipeline_mode = #tpu.pipeline_mode<synchronous>, transform_indices = @transform_14, window_bounds = array<i64: 1, 32>}, {pipeline_mode = #tpu.pipeline_mode<synchronous>, transform_indices = @transform_15, window_bounds = array<i64: 32, 128>}, {pipeline_mode = #tpu.pipeline_mode<synchronous>, transform_indices = @transform_16, window_bounds = array<i64: 1, 128>}, {transform_indices = @transform_17, window_bounds = array<i64: 1, 2, 128>}]} {
    %c0_i32 = arith.constant 0 : i32
    %0 = arith.cmpi eq, %arg1, %c0_i32 : i32
    %1 = arith.extui %0 : i1 to i32
    %c0_i32_0 = arith.constant 0 : i32
    %2 = arith.cmpi ne, %1, %c0_i32_0 : i32
    scf.if %2 {
      %c0_97 = arith.constant 0 : index
      %c0_98 = arith.constant 0 : index
      %c0_99 = arith.constant 0 : index
      %270 = vector.load %arg2[%c0_97, %c0_98, %c0_99] : memref<2x16x32xf32, #tpu.memory_space<vmem>>, vector<1x16x32xf32>
      %271 = vector.shape_cast %270 : vector<1x16x32xf32> to vector<16x32xf32>
      %c0_100 = arith.constant 0 : index
      %c0_101 = arith.constant 0 : index
      %272 = vector.load %arg20[%c0_100, %c0_101] : memref<32x32xf32, #tpu.memory_space<vmem>>, vector<16x32xf32>
      tpu.vector_store %arg20[%c0_100, %c0_101], %271 {strides = array<i32>} : memref<32x32xf32, #tpu.memory_space<vmem>>, vector<16x32xf32>,
      %c1 = arith.constant 1 : index
      %c0_102 = arith.constant 0 : index
      %c0_103 = arith.constant 0 : index
      %273 = vector.load %arg2[%c1, %c0_102, %c0_103] : memref<2x16x32xf32, #tpu.memory_space<vmem>>, vector<1x16x32xf32>
      %274 = vector.shape_cast %273 : vector<1x16x32xf32> to vector<16x32xf32>
      %c16_104 = arith.constant 16 : index
      %c0_105 = arith.constant 0 : index
      %275 = vector.load %arg20[%c16_104, %c0_105] : memref<32x32xf32, #tpu.memory_space<vmem>>, vector<16x32xf32>
      tpu.vector_store %arg20[%c16_104, %c0_105], %274 {strides = array<i32>} : memref<32x32xf32, #tpu.memory_space<vmem>>, vector<16x32xf32>,
    } else {
    }
    %c0 = arith.constant 0 : index
    %c0_1 = arith.constant 0 : index
    %3 = vector.load %arg20[%c0, %c0_1] : memref<32x32xf32, #tpu.memory_space<vmem>>, vector<32x32xf32>
    %4 = tpu.iota {dimensions = array<i32: 1>} : vector<1x16xi32>
    %c9_i32 = arith.constant 9 : i32
    %5 = vector.broadcast %c9_i32 : i32 to vector<1x16xi32>
    %6 = arith.cmpi sge, %4, %5 : vector<1x16xi32>
    %cst = arith.constant -1.000000e+30 : f32
    %cst_2 = arith.constant 0.000000e+00 : f32
    %7 = vector.broadcast %cst : f32 to vector<1x16xf32>
    %8 = vector.broadcast %cst_2 : f32 to vector<1x16xf32>
    %9 = arith.select %6, %7, %8 : vector<1x16xi1>, vector<1x16xf32>
    %c0_3 = arith.constant 0 : index
    %c0_4 = arith.constant 0 : index
    %c0_5 = arith.constant 0 : index
    %10 = vector.load %arg3[%c0_3, %c0_4, %c0_5] : memref<1x1x32xf32, #tpu.memory_space<vmem>>, vector<1x1x32xf32>
    %11 = vector.shape_cast %10 : vector<1x1x32xf32> to vector<1x32xf32>
    %c0_6 = arith.constant 0 : index
    %c0_7 = arith.constant 0 : index
    %c0_8 = arith.constant 0 : index
    %12 = vector.load %arg4[%c0_6, %c0_7, %c0_8] : memref<1x1x32xf32, #tpu.memory_space<vmem>>, vector<1x1x32xf32>
    %13 = vector.shape_cast %12 : vector<1x1x32xf32> to vector<1x32xf32>
    %cst_9 = arith.constant dense<0.000000e+00> : vector<32xf32>
    %14 = vector.multi_reduction <add>, %3, %cst_9 [1] : vector<32x32xf32> to vector<32xf32>
    %15 = vector.shape_cast %14 : vector<32xf32> to vector<32x1xf32>
    %cst_10 = arith.constant 3.200000e+01 : f32
    %16 = vector.broadcast %cst_10 : f32 to vector<32x1xf32>
    %17 = arith.divf %15, %16 : vector<32x1xf32>
    %18 = vector.broadcast %17 : vector<32x1xf32> to vector<32x32xf32>
    %19 = arith.subf %3, %18 : vector<32x32xf32>
    %20 = arith.mulf %19, %19 : vector<32x32xf32>
    %cst_11 = arith.constant dense<0.000000e+00> : vector<32xf32>
    %21 = vector.multi_reduction <add>, %20, %cst_11 [1] : vector<32x32xf32> to vector<32xf32>
    %22 = vector.shape_cast %21 : vector<32xf32> to vector<32x1xf32>
    %cst_12 = arith.constant 3.200000e+01 : f32
    %23 = vector.broadcast %cst_12 : f32 to vector<32x1xf32>
    %24 = arith.divf %22, %23 : vector<32x1xf32>
    %25 = vector.broadcast %17 : vector<32x1xf32> to vector<32x32xf32>
    %26 = arith.subf %3, %25 : vector<32x32xf32>
    %cst_13 = arith.constant 9.99999974E-6 : f32
    %27 = vector.broadcast %cst_13 : f32 to vector<32x1xf32>
    %28 = arith.addf %24, %27 : vector<32x1xf32>
    %29 = math.rsqrt %28 : vector<32x1xf32>
    %30 = vector.broadcast %29 : vector<32x1xf32> to vector<32x32xf32>
    %31 = arith.mulf %26, %30 : vector<32x32xf32>
    %32 = vector.broadcast %11 : vector<1x32xf32> to vector<32x32xf32>
    %33 = arith.mulf %31, %32 : vector<32x32xf32>
    %34 = vector.broadcast %13 : vector<1x32xf32> to vector<32x32xf32>
    %35 = arith.addf %33, %34 : vector<32x32xf32>
    %36 = arith.truncf %35 : vector<32x32xf32> to vector<32x32xbf16>
    %c0_14 = arith.constant 0 : index
    %c0_15 = arith.constant 0 : index
    %c0_16 = arith.constant 0 : index
    %37 = vector.load %arg5[%c0_14, %c0_15, %c0_16] : memref<1x32x96xbf16, #tpu.memory_space<vmem>>, vector<1x32x96xbf16>
    %38 = vector.shape_cast %37 : vector<1x32x96xbf16> to vector<32x96xbf16>
    %cst_17 = arith.constant dense<0.000000e+00> : vector<32x96xf32>
    %39 = tpu.matmul %36, %38, %cst_17 {dimension_numbers = #tpu.dot_dimension_numbers<[1], [0], [0], [1], [0, 0, 1, 1], [], []>} : vector<32x32xbf16>, vector<32x96xbf16>, vector<32x96xf32> -> vector<32x96xf32>
    %c0_18 = arith.constant 0 : index
    %c0_19 = arith.constant 0 : index
    %c0_20 = arith.constant 0 : index
    %40 = vector.load %arg6[%c0_18, %c0_19, %c0_20] : memref<1x1x96xf32, #tpu.memory_space<vmem>>, vector<1x1x96xf32>
    %41 = vector.shape_cast %40 : vector<1x1x96xf32> to vector<1x96xf32>
    %42 = vector.broadcast %41 : vector<1x96xf32> to vector<32x96xf32>
    %43 = arith.addf %39, %42 : vector<32x96xf32>
    %44 = arith.truncf %43 : vector<32x96xf32> to vector<32x96xbf16>
    %45 = vector.extract_strided_slice %44 {offsets = [0, 0], sizes = [16, 8], strides = [1, 1]} : vector<32x96xbf16> to vector<16x8xbf16>
    %46 = vector.extract_strided_slice %44 {offsets = [0, 32], sizes = [16, 8], strides = [1, 1]} : vector<32x96xbf16> to vector<16x8xbf16>
    %47 = vector.extract_strided_slice %44 {offsets = [0, 64], sizes = [16, 8], strides = [1, 1]} : vector<32x96xbf16> to vector<16x8xbf16>
    %cst_21 = arith.constant dense<0.000000e+00> : vector<16x16xf32>
    %48 = tpu.matmul %45, %46, %cst_21 {dimension_numbers = #tpu.dot_dimension_numbers<[1], [1], [0], [0], [0, 0, 1, 0], [], []>} : vector<16x8xbf16>, vector<16x8xbf16>, vector<16x16xf32> -> vector<16x16xf32>
    %49 = vector.broadcast %9 : vector<1x16xf32> to vector<16x16xf32>
    %50 = arith.addf %48, %49 : vector<16x16xf32>
    %cst_22 = arith.constant dense<0xFF800000> : vector<16xf32>
    %51 = vector.multi_reduction <maximumf>, %50, %cst_22 [1] : vector<16x16xf32> to vector<16xf32>
    %52 = vector.shape_cast %51 : vector<16xf32> to vector<16x1xf32>
    %53 = vector.broadcast %52 : vector<16x1xf32> to vector<16x16xf32>
    %54 = arith.subf %50, %53 : vector<16x16xf32>
    %55 = math.exp %54 : vector<16x16xf32>
    %cst_23 = arith.constant dense<0.000000e+00> : vector<16xf32>
    %56 = vector.multi_reduction <add>, %55, %cst_23 [1] : vector<16x16xf32> to vector<16xf32>
    %57 = vector.shape_cast %56 : vector<16xf32> to vector<16x1xf32>
    %58 = tpu.reciprocal %57 {approx = true} : vector<16x1xf32> -> vector<16x1xf32>
    %59 = vector.broadcast %58 : vector<16x1xf32> to vector<16x16xf32>
    %60 = arith.mulf %55, %59 : vector<16x16xf32>
    %61 = arith.truncf %60 : vector<16x16xf32> to vector<16x16xbf16>
    %cst_24 = arith.constant dense<0.000000e+00> : vector<16x8xf32>
    %62 = tpu.matmul %61, %47, %cst_24 {dimension_numbers = #tpu.dot_dimension_numbers<[1], [0], [0], [1], [0, 0, 1, 1], [], []>} : vector<16x16xbf16>, vector<16x8xbf16>, vector<16x8xf32> -> vector<16x8xf32>
    %63 = arith.truncf %62 : vector<16x8xf32> to vector<16x8xbf16>
    %64 = vector.extract_strided_slice %44 {offsets = [0, 8], sizes = [16, 8], strides = [1, 1]} : vector<32x96xbf16> to vector<16x8xbf16>
    %65 = vector.extract_strided_slice %44 {offsets = [0, 40], sizes = [16, 8], strides = [1, 1]} : vector<32x96xbf16> to vector<16x8xbf16>
    %66 = vector.extract_strided_slice %44 {offsets = [0, 72], sizes = [16, 8], strides = [1, 1]} : vector<32x96xbf16> to vector<16x8xbf16>
    %cst_25 = arith.constant dense<0.000000e+00> : vector<16x16xf32>
    %67 = tpu.matmul %64, %65, %cst_25 {dimension_numbers = #tpu.dot_dimension_numbers<[1], [1], [0], [0], [0, 0, 1, 0], [], []>} : vector<16x8xbf16>, vector<16x8xbf16>, vector<16x16xf32> -> vector<16x16xf32>
    %68 = vector.broadcast %9 : vector<1x16xf32> to vector<16x16xf32>
    %69 = arith.addf %67, %68 : vector<16x16xf32>
    %cst_26 = arith.constant dense<0xFF800000> : vector<16xf32>
    %70 = vector.multi_reduction <maximumf>, %69, %cst_26 [1] : vector<16x16xf32> to vector<16xf32>
    %71 = vector.shape_cast %70 : vector<16xf32> to vector<16x1xf32>
    %72 = vector.broadcast %71 : vector<16x1xf32> to vector<16x16xf32>
    %73 = arith.subf %69, %72 : vector<16x16xf32>
    %74 = math.exp %73 : vector<16x16xf32>
    %cst_27 = arith.constant dense<0.000000e+00> : vector<16xf32>
    %75 = vector.multi_reduction <add>, %74, %cst_27 [1] : vector<16x16xf32> to vector<16xf32>
    %76 = vector.shape_cast %75 : vector<16xf32> to vector<16x1xf32>
    %77 = tpu.reciprocal %76 {approx = true} : vector<16x1xf32> -> vector<16x1xf32>
    %78 = vector.broadcast %77 : vector<16x1xf32> to vector<16x16xf32>
    %79 = arith.mulf %74, %78 : vector<16x16xf32>
    %80 = arith.truncf %79 : vector<16x16xf32> to vector<16x16xbf16>
    %cst_28 = arith.constant dense<0.000000e+00> : vector<16x8xf32>
    %81 = tpu.matmul %80, %66, %cst_28 {dimension_numbers = #tpu.dot_dimension_numbers<[1], [0], [0], [1], [0, 0, 1, 1], [], []>} : vector<16x16xbf16>, vector<16x8xbf16>, vector<16x8xf32> -> vector<16x8xf32>
    %82 = arith.truncf %81 : vector<16x8xf32> to vector<16x8xbf16>
    %83 = vector.extract_strided_slice %44 {offsets = [0, 16], sizes = [16, 8], strides = [1, 1]} : vector<32x96xbf16> to vector<16x8xbf16>
    %84 = vector.extract_strided_slice %44 {offsets = [0, 48], sizes = [16, 8], strides = [1, 1]} : vector<32x96xbf16> to vector<16x8xbf16>
    %85 = vector.extract_strided_slice %44 {offsets = [0, 80], sizes = [16, 8], strides = [1, 1]} : vector<32x96xbf16> to vector<16x8xbf16>
    %cst_29 = arith.constant dense<0.000000e+00> : vector<16x16xf32>
    %86 = tpu.matmul %83, %84, %cst_29 {dimension_numbers = #tpu.dot_dimension_numbers<[1], [1], [0], [0], [0, 0, 1, 0], [], []>} : vector<16x8xbf16>, vector<16x8xbf16>, vector<16x16xf32> -> vector<16x16xf32>
    %87 = vector.broadcast %9 : vector<1x16xf32> to vector<16x16xf32>
    %88 = arith.addf %86, %87 : vector<16x16xf32>
    %cst_30 = arith.constant dense<0xFF800000> : vector<16xf32>
    %89 = vector.multi_reduction <maximumf>, %88, %cst_30 [1] : vector<16x16xf32> to vector<16xf32>
    %90 = vector.shape_cast %89 : vector<16xf32> to vector<16x1xf32>
    %91 = vector.broadcast %90 : vector<16x1xf32> to vector<16x16xf32>
    %92 = arith.subf %88, %91 : vector<16x16xf32>
    %93 = math.exp %92 : vector<16x16xf32>
    %cst_31 = arith.constant dense<0.000000e+00> : vector<16xf32>
    %94 = vector.multi_reduction <add>, %93, %cst_31 [1] : vector<16x16xf32> to vector<16xf32>
    %95 = vector.shape_cast %94 : vector<16xf32> to vector<16x1xf32>
    %96 = tpu.reciprocal %95 {approx = true} : vector<16x1xf32> -> vector<16x1xf32>
    %97 = vector.broadcast %96 : vector<16x1xf32> to vector<16x16xf32>
    %98 = arith.mulf %93, %97 : vector<16x16xf32>
    %99 = arith.truncf %98 : vector<16x16xf32> to vector<16x16xbf16>
    %cst_32 = arith.constant dense<0.000000e+00> : vector<16x8xf32>
    %100 = tpu.matmul %99, %85, %cst_32 {dimension_numbers = #tpu.dot_dimension_numbers<[1], [0], [0], [1], [0, 0, 1, 1], [], []>} : vector<16x16xbf16>, vector<16x8xbf16>, vector<16x8xf32> -> vector<16x8xf32>
    %101 = arith.truncf %100 : vector<16x8xf32> to vector<16x8xbf16>
    %102 = vector.extract_strided_slice %44 {offsets = [0, 24], sizes = [16, 8], strides = [1, 1]} : vector<32x96xbf16> to vector<16x8xbf16>
    %103 = vector.extract_strided_slice %44 {offsets = [0, 56], sizes = [16, 8], strides = [1, 1]} : vector<32x96xbf16> to vector<16x8xbf16>
    %104 = vector.extract_strided_slice %44 {offsets = [0, 88], sizes = [16, 8], strides = [1, 1]} : vector<32x96xbf16> to vector<16x8xbf16>
    %cst_33 = arith.constant dense<0.000000e+00> : vector<16x16xf32>
    %105 = tpu.matmul %102, %103, %cst_33 {dimension_numbers = #tpu.dot_dimension_numbers<[1], [1], [0], [0], [0, 0, 1, 0], [], []>} : vector<16x8xbf16>, vector<16x8xbf16>, vector<16x16xf32> -> vector<16x16xf32>
    %106 = vector.broadcast %9 : vector<1x16xf32> to vector<16x16xf32>
    %107 = arith.addf %105, %106 : vector<16x16xf32>
    %cst_34 = arith.constant dense<0xFF800000> : vector<16xf32>
    %108 = vector.multi_reduction <maximumf>, %107, %cst_34 [1] : vector<16x16xf32> to vector<16xf32>
    %109 = vector.shape_cast %108 : vector<16xf32> to vector<16x1xf32>
    %110 = vector.broadcast %109 : vector<16x1xf32> to vector<16x16xf32>
    %111 = arith.subf %107, %110 : vector<16x16xf32>
    %112 = math.exp %111 : vector<16x16xf32>
    %cst_35 = arith.constant dense<0.000000e+00> : vector<16xf32>
    %113 = vector.multi_reduction <add>, %112, %cst_35 [1] : vector<16x16xf32> to vector<16xf32>
    %114 = vector.shape_cast %113 : vector<16xf32> to vector<16x1xf32>
    %115 = tpu.reciprocal %114 {approx = true} : vector<16x1xf32> -> vector<16x1xf32>
    %116 = vector.broadcast %115 : vector<16x1xf32> to vector<16x16xf32>
    %117 = arith.mulf %112, %116 : vector<16x16xf32>
    %118 = arith.truncf %117 : vector<16x16xf32> to vector<16x16xbf16>
    %cst_36 = arith.constant dense<0.000000e+00> : vector<16x8xf32>
    %119 = tpu.matmul %118, %104, %cst_36 {dimension_numbers = #tpu.dot_dimension_numbers<[1], [0], [0], [1], [0, 0, 1, 1], [], []>} : vector<16x16xbf16>, vector<16x8xbf16>, vector<16x8xf32> -> vector<16x8xf32>
    %120 = arith.truncf %119 : vector<16x8xf32> to vector<16x8xbf16>
    %121 = tpu.concatenate %63, %82, %101, %120 in 1 : vector<16x8xbf16>, vector<16x8xbf16>, vector<16x8xbf16>, vector<16x8xbf16> -> vector<16x32xbf16>
    %c0_37 = arith.constant 0 : index
    %c0_38 = arith.constant 0 : index
    %122 = vector.load %arg21[%c0_37, %c0_38] : memref<32x32xbf16, #tpu.memory_space<vmem>>, vector<16x32xbf16>
    tpu.vector_store %arg21[%c0_37, %c0_38], %121 {strides = array<i32>} : memref<32x32xbf16, #tpu.memory_space<vmem>>, vector<16x32xbf16>,
    %123 = vector.extract_strided_slice %44 {offsets = [16, 0], sizes = [16, 8], strides = [1, 1]} : vector<32x96xbf16> to vector<16x8xbf16>
    %124 = vector.extract_strided_slice %44 {offsets = [16, 32], sizes = [16, 8], strides = [1, 1]} : vector<32x96xbf16> to vector<16x8xbf16>
    %125 = vector.extract_strided_slice %44 {offsets = [16, 64], sizes = [16, 8], strides = [1, 1]} : vector<32x96xbf16> to vector<16x8xbf16>
    %cst_39 = arith.constant dense<0.000000e+00> : vector<16x16xf32>
    %126 = tpu.matmul %123, %124, %cst_39 {dimension_numbers = #tpu.dot_dimension_numbers<[1], [1], [0], [0], [0, 0, 1, 0], [], []>} : vector<16x8xbf16>, vector<16x8xbf16>, vector<16x16xf32> -> vector<16x16xf32>
    %127 = vector.broadcast %9 : vector<1x16xf32> to vector<16x16xf32>
    %128 = arith.addf %126, %127 : vector<16x16xf32>
    %cst_40 = arith.constant dense<0xFF800000> : vector<16xf32>
    %129 = vector.multi_reduction <maximumf>, %128, %cst_40 [1] : vector<16x16xf32> to vector<16xf32>
    %130 = vector.shape_cast %129 : vector<16xf32> to vector<16x1xf32>
    %131 = vector.broadcast %130 : vector<16x1xf32> to vector<16x16xf32>
    %132 = arith.subf %128, %131 : vector<16x16xf32>
    %133 = math.exp %132 : vector<16x16xf32>
    %cst_41 = arith.constant dense<0.000000e+00> : vector<16xf32>
    %134 = vector.multi_reduction <add>, %133, %cst_41 [1] : vector<16x16xf32> to vector<16xf32>
    %135 = vector.shape_cast %134 : vector<16xf32> to vector<16x1xf32>
    %136 = tpu.reciprocal %135 {approx = true} : vector<16x1xf32> -> vector<16x1xf32>
    %137 = vector.broadcast %136 : vector<16x1xf32> to vector<16x16xf32>
    %138 = arith.mulf %133, %137 : vector<16x16xf32>
    %139 = arith.truncf %138 : vector<16x16xf32> to vector<16x16xbf16>
    %cst_42 = arith.constant dense<0.000000e+00> : vector<16x8xf32>
    %140 = tpu.matmul %139, %125, %cst_42 {dimension_numbers = #tpu.dot_dimension_numbers<[1], [0], [0], [1], [0, 0, 1, 1], [], []>} : vector<16x16xbf16>, vector<16x8xbf16>, vector<16x8xf32> -> vector<16x8xf32>
    %141 = arith.truncf %140 : vector<16x8xf32> to vector<16x8xbf16>
    %142 = vector.extract_strided_slice %44 {offsets = [16, 8], sizes = [16, 8], strides = [1, 1]} : vector<32x96xbf16> to vector<16x8xbf16>
    %143 = vector.extract_strided_slice %44 {offsets = [16, 40], sizes = [16, 8], strides = [1, 1]} : vector<32x96xbf16> to vector<16x8xbf16>
    %144 = vector.extract_strided_slice %44 {offsets = [16, 72], sizes = [16, 8], strides = [1, 1]} : vector<32x96xbf16> to vector<16x8xbf16>
    %cst_43 = arith.constant dense<0.000000e+00> : vector<16x16xf32>
    %145 = tpu.matmul %142, %143, %cst_43 {dimension_numbers = #tpu.dot_dimension_numbers<[1], [1], [0], [0], [0, 0, 1, 0], [], []>} : vector<16x8xbf16>, vector<16x8xbf16>, vector<16x16xf32> -> vector<16x16xf32>
    %146 = vector.broadcast %9 : vector<1x16xf32> to vector<16x16xf32>
    %147 = arith.addf %145, %146 : vector<16x16xf32>
    %cst_44 = arith.constant dense<0xFF800000> : vector<16xf32>
    %148 = vector.multi_reduction <maximumf>, %147, %cst_44 [1] : vector<16x16xf32> to vector<16xf32>
    %149 = vector.shape_cast %148 : vector<16xf32> to vector<16x1xf32>
    %150 = vector.broadcast %149 : vector<16x1xf32> to vector<16x16xf32>
    %151 = arith.subf %147, %150 : vector<16x16xf32>
    %152 = math.exp %151 : vector<16x16xf32>
    %cst_45 = arith.constant dense<0.000000e+00> : vector<16xf32>
    %153 = vector.multi_reduction <add>, %152, %cst_45 [1] : vector<16x16xf32> to vector<16xf32>
    %154 = vector.shape_cast %153 : vector<16xf32> to vector<16x1xf32>
    %155 = tpu.reciprocal %154 {approx = true} : vector<16x1xf32> -> vector<16x1xf32>
    %156 = vector.broadcast %155 : vector<16x1xf32> to vector<16x16xf32>
    %157 = arith.mulf %152, %156 : vector<16x16xf32>
    %158 = arith.truncf %157 : vector<16x16xf32> to vector<16x16xbf16>
    %cst_46 = arith.constant dense<0.000000e+00> : vector<16x8xf32>
    %159 = tpu.matmul %158, %144, %cst_46 {dimension_numbers = #tpu.dot_dimension_numbers<[1], [0], [0], [1], [0, 0, 1, 1], [], []>} : vector<16x16xbf16>, vector<16x8xbf16>, vector<16x8xf32> -> vector<16x8xf32>
    %160 = arith.truncf %159 : vector<16x8xf32> to vector<16x8xbf16>
    %161 = vector.extract_strided_slice %44 {offsets = [16, 16], sizes = [16, 8], strides = [1, 1]} : vector<32x96xbf16> to vector<16x8xbf16>
    %162 = vector.extract_strided_slice %44 {offsets = [16, 48], sizes = [16, 8], strides = [1, 1]} : vector<32x96xbf16> to vector<16x8xbf16>
    %163 = vector.extract_strided_slice %44 {offsets = [16, 80], sizes = [16, 8], strides = [1, 1]} : vector<32x96xbf16> to vector<16x8xbf16>
    %cst_47 = arith.constant dense<0.000000e+00> : vector<16x16xf32>
    %164 = tpu.matmul %161, %162, %cst_47 {dimension_numbers = #tpu.dot_dimension_numbers<[1], [1], [0], [0], [0, 0, 1, 0], [], []>} : vector<16x8xbf16>, vector<16x8xbf16>, vector<16x16xf32> -> vector<16x16xf32>
    %165 = vector.broadcast %9 : vector<1x16xf32> to vector<16x16xf32>
    %166 = arith.addf %164, %165 : vector<16x16xf32>
    %cst_48 = arith.constant dense<0xFF800000> : vector<16xf32>
    %167 = vector.multi_reduction <maximumf>, %166, %cst_48 [1] : vector<16x16xf32> to vector<16xf32>
    %168 = vector.shape_cast %167 : vector<16xf32> to vector<16x1xf32>
    %169 = vector.broadcast %168 : vector<16x1xf32> to vector<16x16xf32>
    %170 = arith.subf %166, %169 : vector<16x16xf32>
    %171 = math.exp %170 : vector<16x16xf32>
    %cst_49 = arith.constant dense<0.000000e+00> : vector<16xf32>
    %172 = vector.multi_reduction <add>, %171, %cst_49 [1] : vector<16x16xf32> to vector<16xf32>
    %173 = vector.shape_cast %172 : vector<16xf32> to vector<16x1xf32>
    %174 = tpu.reciprocal %173 {approx = true} : vector<16x1xf32> -> vector<16x1xf32>
    %175 = vector.broadcast %174 : vector<16x1xf32> to vector<16x16xf32>
    %176 = arith.mulf %171, %175 : vector<16x16xf32>
    %177 = arith.truncf %176 : vector<16x16xf32> to vector<16x16xbf16>
    %cst_50 = arith.constant dense<0.000000e+00> : vector<16x8xf32>
    %178 = tpu.matmul %177, %163, %cst_50 {dimension_numbers = #tpu.dot_dimension_numbers<[1], [0], [0], [1], [0, 0, 1, 1], [], []>} : vector<16x16xbf16>, vector<16x8xbf16>, vector<16x8xf32> -> vector<16x8xf32>
    %179 = arith.truncf %178 : vector<16x8xf32> to vector<16x8xbf16>
    %180 = vector.extract_strided_slice %44 {offsets = [16, 24], sizes = [16, 8], strides = [1, 1]} : vector<32x96xbf16> to vector<16x8xbf16>
    %181 = vector.extract_strided_slice %44 {offsets = [16, 56], sizes = [16, 8], strides = [1, 1]} : vector<32x96xbf16> to vector<16x8xbf16>
    %182 = vector.extract_strided_slice %44 {offsets = [16, 88], sizes = [16, 8], strides = [1, 1]} : vector<32x96xbf16> to vector<16x8xbf16>
    %cst_51 = arith.constant dense<0.000000e+00> : vector<16x16xf32>
    %183 = tpu.matmul %180, %181, %cst_51 {dimension_numbers = #tpu.dot_dimension_numbers<[1], [1], [0], [0], [0, 0, 1, 0], [], []>} : vector<16x8xbf16>, vector<16x8xbf16>, vector<16x16xf32> -> vector<16x16xf32>
    %184 = vector.broadcast %9 : vector<1x16xf32> to vector<16x16xf32>
    %185 = arith.addf %183, %184 : vector<16x16xf32>
    %cst_52 = arith.constant dense<0xFF800000> : vector<16xf32>
    %186 = vector.multi_reduction <maximumf>, %185, %cst_52 [1] : vector<16x16xf32> to vector<16xf32>
    %187 = vector.shape_cast %186 : vector<16xf32> to vector<16x1xf32>
    %188 = vector.broadcast %187 : vector<16x1xf32> to vector<16x16xf32>
    %189 = arith.subf %185, %188 : vector<16x16xf32>
    %190 = math.exp %189 : vector<16x16xf32>
    %cst_53 = arith.constant dense<0.000000e+00> : vector<16xf32>
    %191 = vector.multi_reduction <add>, %190, %cst_53 [1] : vector<16x16xf32> to vector<16xf32>
    %192 = vector.shape_cast %191 : vector<16xf32> to vector<16x1xf32>
    %193 = tpu.reciprocal %192 {approx = true} : vector<16x1xf32> -> vector<16x1xf32>
    %194 = vector.broadcast %193 : vector<16x1xf32> to vector<16x16xf32>
    %195 = arith.mulf %190, %194 : vector<16x16xf32>
    %196 = arith.truncf %195 : vector<16x16xf32> to vector<16x16xbf16>
    %cst_54 = arith.constant dense<0.000000e+00> : vector<16x8xf32>
    %197 = tpu.matmul %196, %182, %cst_54 {dimension_numbers = #tpu.dot_dimension_numbers<[1], [0], [0], [1], [0, 0, 1, 1], [], []>} : vector<16x16xbf16>, vector<16x8xbf16>, vector<16x8xf32> -> vector<16x8xf32>
    %198 = arith.truncf %197 : vector<16x8xf32> to vector<16x8xbf16>
    %199 = tpu.concatenate %141, %160, %179, %198 in 1 : vector<16x8xbf16>, vector<16x8xbf16>, vector<16x8xbf16>, vector<16x8xbf16> -> vector<16x32xbf16>
    %c16 = arith.constant 16 : index
    %c0_55 = arith.constant 0 : index
    %200 = vector.load %arg21[%c16, %c0_55] : memref<32x32xbf16, #tpu.memory_space<vmem>>, vector<16x32xbf16>
    tpu.vector_store %arg21[%c16, %c0_55], %199 {strides = array<i32>} : memref<32x32xbf16, #tpu.memory_space<vmem>>, vector<16x32xbf16>,
    %c0_56 = arith.constant 0 : index
    %c0_57 = arith.constant 0 : index
    %201 = vector.load %arg21[%c0_56, %c0_57] : memref<32x32xbf16, #tpu.memory_space<vmem>>, vector<32x32xbf16>
    %c0_58 = arith.constant 0 : index
    %c0_59 = arith.constant 0 : index
    %c0_60 = arith.constant 0 : index
    %202 = vector.load %arg7[%c0_58, %c0_59, %c0_60] : memref<1x32x32xbf16, #tpu.memory_space<vmem>>, vector<1x32x32xbf16>
    %203 = vector.shape_cast %202 : vector<1x32x32xbf16> to vector<32x32xbf16>
    %cst_61 = arith.constant dense<0.000000e+00> : vector<32x32xf32>
    %204 = tpu.matmul %201, %203, %cst_61 {dimension_numbers = #tpu.dot_dimension_numbers<[1], [0], [0], [1], [0, 0, 1, 1], [], []>} : vector<32x32xbf16>, vector<32x32xbf16>, vector<32x32xf32> -> vector<32x32xf32>
    %c0_62 = arith.constant 0 : index
    %c0_63 = arith.constant 0 : index
    %c0_64 = arith.constant 0 : index
    %205 = vector.load %arg8[%c0_62, %c0_63, %c0_64] : memref<1x1x32xf32, #tpu.memory_space<vmem>>, vector<1x1x32xf32>
    %206 = vector.shape_cast %205 : vector<1x1x32xf32> to vector<1x32xf32>
    %207 = vector.broadcast %206 : vector<1x32xf32> to vector<32x32xf32>
    %208 = arith.addf %204, %207 : vector<32x32xf32>
    %209 = arith.addf %3, %208 : vector<32x32xf32>
    %c0_65 = arith.constant 0 : index
    %c0_66 = arith.constant 0 : index
    %c0_67 = arith.constant 0 : index
    %210 = vector.load %arg9[%c0_65, %c0_66, %c0_67] : memref<1x1x32xf32, #tpu.memory_space<vmem>>, vector<1x1x32xf32>
    %211 = vector.shape_cast %210 : vector<1x1x32xf32> to vector<1x32xf32>
    %c0_68 = arith.constant 0 : index
    %c0_69 = arith.constant 0 : index
    %c0_70 = arith.constant 0 : index
    %212 = vector.load %arg10[%c0_68, %c0_69, %c0_70] : memref<1x1x32xf32, #tpu.memory_space<vmem>>, vector<1x1x32xf32>
    %213 = vector.shape_cast %212 : vector<1x1x32xf32> to vector<1x32xf32>
    %cst_71 = arith.constant dense<0.000000e+00> : vector<32xf32>
    %214 = vector.multi_reduction <add>, %209, %cst_71 [1] : vector<32x32xf32> to vector<32xf32>
    %215 = vector.shape_cast %214 : vector<32xf32> to vector<32x1xf32>
    %cst_72 = arith.constant 3.200000e+01 : f32
    %216 = vector.broadcast %cst_72 : f32 to vector<32x1xf32>
    %217 = arith.divf %215, %216 : vector<32x1xf32>
    %218 = vector.broadcast %217 : vector<32x1xf32> to vector<32x32xf32>
    %219 = arith.subf %209, %218 : vector<32x32xf32>
    %220 = arith.mulf %219, %219 : vector<32x32xf32>
    %cst_73 = arith.constant dense<0.000000e+00> : vector<32xf32>
    %221 = vector.multi_reduction <add>, %220, %cst_73 [1] : vector<32x32xf32> to vector<32xf32>
    %222 = vector.shape_cast %221 : vector<32xf32> to vector<32x1xf32>
    %cst_74 = arith.constant 3.200000e+01 : f32
    %223 = vector.broadcast %cst_74 : f32 to vector<32x1xf32>
    %224 = arith.divf %222, %223 : vector<32x1xf32>
    %225 = vector.broadcast %217 : vector<32x1xf32> to vector<32x32xf32>
    %226 = arith.subf %209, %225 : vector<32x32xf32>
    %cst_75 = arith.constant 9.99999974E-6 : f32
    %227 = vector.broadcast %cst_75 : f32 to vector<32x1xf32>
    %228 = arith.addf %224, %227 : vector<32x1xf32>
    %229 = math.rsqrt %228 : vector<32x1xf32>
    %230 = vector.broadcast %229 : vector<32x1xf32> to vector<32x32xf32>
    %231 = arith.mulf %226, %230 : vector<32x32xf32>
    %232 = vector.broadcast %211 : vector<1x32xf32> to vector<32x32xf32>
    %233 = arith.mulf %231, %232 : vector<32x32xf32>
    %234 = vector.broadcast %213 : vector<1x32xf32> to vector<32x32xf32>
    %235 = arith.addf %233, %234 : vector<32x32xf32>
    %236 = arith.truncf %235 : vector<32x32xf32> to vector<32x32xbf16>
    %c0_76 = arith.constant 0 : index
    %c0_77 = arith.constant 0 : index
    %c0_78 = arith.constant 0 : index
    %237 = vector.load %arg11[%c0_76, %c0_77, %c0_78] : memref<1x32x128xbf16, #tpu.memory_space<vmem>>, vector<1x32x128xbf16>
    %238 = vector.shape_cast %237 : vector<1x32x128xbf16> to vector<32x128xbf16>
    %cst_79 = arith.constant dense<0.000000e+00> : vector<32x128xf32>
    %239 = tpu.matmul %236, %238, %cst_79 {dimension_numbers = #tpu.dot_dimension_numbers<[1], [0], [0], [1], [0, 0, 1, 1], [], []>} : vector<32x32xbf16>, vector<32x128xbf16>, vector<32x128xf32> -> vector<32x128xf32>
    %c0_80 = arith.constant 0 : index
    %c0_81 = arith.constant 0 : index
    %c0_82 = arith.constant 0 : index
    %240 = vector.load %arg12[%c0_80, %c0_81, %c0_82] : memref<1x1x128xf32, #tpu.memory_space<vmem>>, vector<1x1x128xf32>
    %241 = vector.shape_cast %240 : vector<1x1x128xf32> to vector<1x128xf32>
    %242 = vector.broadcast %241 : vector<1x128xf32> to vector<32x128xf32>
    %243 = arith.addf %239, %242 : vector<32x128xf32>
    %cst_83 = arith.constant 5.000000e-01 : f32
    %244 = vector.broadcast %cst_83 : f32 to vector<32x128xf32>
    %245 = arith.mulf %244, %243 : vector<32x128xf32>
    %cst_84 = arith.constant 4.471500e-02 : f32
    %246 = vector.broadcast %cst_84 : f32 to vector<32x128xf32>
    %247 = arith.mulf %246, %243 : vector<32x128xf32>
    %248 = arith.mulf %247, %243 : vector<32x128xf32>
    %249 = arith.mulf %248, %243 : vector<32x128xf32>
    %250 = arith.addf %243, %249 : vector<32x128xf32>
    %cst_85 = arith.constant 0.797884583 : f32
    %251 = vector.broadcast %cst_85 : f32 to vector<32x128xf32>
    %252 = arith.mulf %251, %250 : vector<32x128xf32>
    %253 = math.tanh %252 : vector<32x128xf32>
    %cst_86 = arith.constant 1.000000e+00 : f32
    %254 = vector.broadcast %cst_86 : f32 to vector<32x128xf32>
    %255 = arith.addf %254, %253 : vector<32x128xf32>
    %256 = arith.mulf %245, %255 : vector<32x128xf32>
    %257 = arith.truncf %256 : vector<32x128xf32> to vector<32x128xbf16>
    %c0_87 = arith.constant 0 : index
    %c0_88 = arith.constant 0 : index
    %c0_89 = arith.constant 0 : index
    %258 = vector.load %arg13[%c0_87, %c0_88, %c0_89] : memref<1x128x32xbf16, #tpu.memory_space<vmem>>, vector<1x128x32xbf16>
    %259 = vector.shape_cast %258 : vector<1x128x32xbf16> to vector<128x32xbf16>
    %cst_90 = arith.constant dense<0.000000e+00> : vector<32x32xf32>
    %260 = tpu.matmul %257, %259, %cst_90 {dimension_numbers = #tpu.dot_dimension_numbers<[1], [0], [0], [1], [0, 0, 1, 1], [], []>} : vector<32x128xbf16>, vector<128x32xbf16>, vector<32x32xf32> -> vector<32x32xf32>
    %c0_91 = arith.constant 0 : index
    %c0_92 = arith.constant 0 : index
    %c0_93 = arith.constant 0 : index
    %261 = vector.load %arg14[%c0_91, %c0_92, %c0_93] : memref<1x1x32xf32, #tpu.memory_space<vmem>>, vector<1x1x32xf32>
    %262 = vector.shape_cast %261 : vector<1x1x32xf32> to vector<1x32xf32>
    %263 = vector.broadcast %262 : vector<1x32xf32> to vector<32x32xf32>
    %264 = arith.addf %260, %263 : vector<32x32xf32>
    %265 = arith.addf %209, %264 : vector<32x32xf32>
    %c0_94 = arith.constant 0 : index
    %c0_95 = arith.constant 0 : index
    %266 = vector.load %arg20[%c0_94, %c0_95] : memref<32x32xf32, #tpu.memory_space<vmem>>, vector<32x32xf32>
    tpu.vector_store %arg20[%c0_94, %c0_95], %265 {strides = array<i32>} : memref<32x32xf32, #tpu.memory_space<vmem>>, vector<32x32xf32>,
    %c1_i32 = arith.constant 1 : i32
    %267 = arith.cmpi eq, %arg1, %c1_i32 : i32
    %268 = arith.extui %267 : i1 to i32
    %c0_i32_96 = arith.constant 0 : i32
    %269 = arith.cmpi ne, %268, %c0_i32_96 : i32
    scf.if %269 {
      %270 = vector.extract_strided_slice %265 {offsets = [0, 0], sizes = [1, 32], strides = [1, 1]} : vector<32x32xf32> to vector<1x32xf32>
      %271 = vector.extract_strided_slice %265 {offsets = [16, 0], sizes = [1, 32], strides = [1, 1]} : vector<32x32xf32> to vector<1x32xf32>
      %272 = tpu.concatenate %270, %271 in 0 : vector<1x32xf32>, vector<1x32xf32> -> vector<2x32xf32>
      %c0_97 = arith.constant 0 : index
      %c0_98 = arith.constant 0 : index
      %273 = vector.load %arg15[%c0_97, %c0_98] : memref<1x32xf32, #tpu.memory_space<vmem>>, vector<1x32xf32>
      %c0_99 = arith.constant 0 : index
      %c0_100 = arith.constant 0 : index
      %274 = vector.load %arg16[%c0_99, %c0_100] : memref<1x32xf32, #tpu.memory_space<vmem>>, vector<1x32xf32>
      %cst_101 = arith.constant dense<0.000000e+00> : vector<2xf32>
      %275 = vector.multi_reduction <add>, %272, %cst_101 [1] : vector<2x32xf32> to vector<2xf32>
      %276 = vector.shape_cast %275 : vector<2xf32> to vector<2x1xf32>
      %cst_102 = arith.constant 3.200000e+01 : f32
      %277 = vector.broadcast %cst_102 : f32 to vector<2x1xf32>
      %278 = arith.divf %276, %277 : vector<2x1xf32>
      %279 = vector.broadcast %278 : vector<2x1xf32> to vector<2x32xf32>
      %280 = arith.subf %272, %279 : vector<2x32xf32>
      %281 = arith.mulf %280, %280 : vector<2x32xf32>
      %cst_103 = arith.constant dense<0.000000e+00> : vector<2xf32>
      %282 = vector.multi_reduction <add>, %281, %cst_103 [1] : vector<2x32xf32> to vector<2xf32>
      %283 = vector.shape_cast %282 : vector<2xf32> to vector<2x1xf32>
      %cst_104 = arith.constant 3.200000e+01 : f32
      %284 = vector.broadcast %cst_104 : f32 to vector<2x1xf32>
      %285 = arith.divf %283, %284 : vector<2x1xf32>
      %286 = vector.broadcast %278 : vector<2x1xf32> to vector<2x32xf32>
      %287 = arith.subf %272, %286 : vector<2x32xf32>
      %cst_105 = arith.constant 9.99999974E-6 : f32
      %288 = vector.broadcast %cst_105 : f32 to vector<2x1xf32>
      %289 = arith.addf %285, %288 : vector<2x1xf32>
      %290 = math.rsqrt %289 : vector<2x1xf32>
      %291 = vector.broadcast %290 : vector<2x1xf32> to vector<2x32xf32>
      %292 = arith.mulf %287, %291 : vector<2x32xf32>
      %293 = vector.broadcast %273 : vector<1x32xf32> to vector<2x32xf32>
      %294 = arith.mulf %292, %293 : vector<2x32xf32>
      %295 = vector.broadcast %274 : vector<1x32xf32> to vector<2x32xf32>
      %296 = arith.addf %294, %295 : vector<2x32xf32>
      %297 = arith.truncf %296 : vector<2x32xf32> to vector<2x32xbf16>
      %c0_106 = arith.constant 0 : index
      %c0_107 = arith.constant 0 : index
      %298 = vector.load %arg17[%c0_106, %c0_107] : memref<32x128xbf16, #tpu.memory_space<vmem>>, vector<32x128xbf16>
      %cst_108 = arith.constant dense<0.000000e+00> : vector<2x128xf32>
      %299 = tpu.matmul %297, %298, %cst_108 {dimension_numbers = #tpu.dot_dimension_numbers<[1], [0], [0], [1], [0, 0, 1, 1], [], []>} : vector<2x32xbf16>, vector<32x128xbf16>, vector<2x128xf32> -> vector<2x128xf32>
      %c0_109 = arith.constant 0 : index
      %c0_110 = arith.constant 0 : index
      %300 = vector.load %arg18[%c0_109, %c0_110] : memref<1x128xf32, #tpu.memory_space<vmem>>, vector<1x128xf32>
      %301 = vector.broadcast %300 : vector<1x128xf32> to vector<2x128xf32>
      %302 = arith.addf %299, %301 : vector<2x128xf32>
      %c0_111 = arith.constant 0 : index
      %c0_112 = arith.constant 0 : index
      %c0_113 = arith.constant 0 : index
      %303 = vector.load %arg19[%c0_111, %c0_112, %c0_113] : memref<1x2x128xf32, #tpu.memory_space<vmem>>, vector<1x2x128xf32>
      %304 = vector.shape_cast %303 : vector<1x2x128xf32> to vector<2x128xf32>
      %305 = vector.shape_cast %302 : vector<2x128xf32> to vector<1x2x128xf32>
      tpu.vector_store %arg19[%c0_111, %c0_112, %c0_113], %305 {strides = array<i32>} : memref<1x2x128xf32, #tpu.memory_space<vmem>>, vector<1x2x128xf32>,
    } else {
    }
    return
  }
  func.func @transform_0(%arg0: i32, %arg1: i32) -> (i32, i32, i32) {
    %c0_i32 = arith.constant 0 : i32
    %c0_i32_0 = arith.constant 0 : i32
    %c0_i32_1 = arith.constant 0 : i32
    return %arg0, %c0_i32, %c0_i32_0 : i32, i32, i32
  }
  func.func @transform_1(%arg0: i32, %arg1: i32) -> (i32, i32, i32) {
    %c0_i32 = arith.constant 0 : i32
    %c0_i32_0 = arith.constant 0 : i32
    %c0_i32_1 = arith.constant 0 : i32
    return %arg1, %c0_i32, %c0_i32_0 : i32, i32, i32
  }
  func.func @transform_2(%arg0: i32, %arg1: i32) -> (i32, i32, i32) {
    %c0_i32 = arith.constant 0 : i32
    %c0_i32_0 = arith.constant 0 : i32
    %c0_i32_1 = arith.constant 0 : i32
    return %arg1, %c0_i32, %c0_i32_0 : i32, i32, i32
  }
  func.func @transform_3(%arg0: i32, %arg1: i32) -> (i32, i32, i32) {
    %c0_i32 = arith.constant 0 : i32
    %c0_i32_0 = arith.constant 0 : i32
    %c0_i32_1 = arith.constant 0 : i32
    return %arg1, %c0_i32, %c0_i32_0 : i32, i32, i32
  }
  func.func @transform_4(%arg0: i32, %arg1: i32) -> (i32, i32, i32) {
    %c0_i32 = arith.constant 0 : i32
    %c0_i32_0 = arith.constant 0 : i32
    %c0_i32_1 = arith.constant 0 : i32
    return %arg1, %c0_i32, %c0_i32_0 : i32, i32, i32
  }
  func.func @transform_5(%arg0: i32, %arg1: i32) -> (i32, i32, i32) {
    %c0_i32 = arith.constant 0 : i32
    %c0_i32_0 = arith.constant 0 : i32
    %c0_i32_1 = arith.constant 0 : i32
    return %arg1, %c0_i32, %c0_i32_0 : i32, i32, i32
  }
  func.func @transform_6(%arg0: i32, %arg1: i32) -> (i32, i32, i32) {
    %c0_i32 = arith.constant 0 : i32
    %c0_i32_0 = arith.constant 0 : i32
    %c0_i32_1 = arith.constant 0 : i32
    return %arg1, %c0_i32, %c0_i32_0 : i32, i32, i32
  }
  func.func @transform_7(%arg0: i32, %arg1: i32) -> (i32, i32, i32) {
    %c0_i32 = arith.constant 0 : i32
    %c0_i32_0 = arith.constant 0 : i32
    %c0_i32_1 = arith.constant 0 : i32
    return %arg1, %c0_i32, %c0_i32_0 : i32, i32, i32
  }
  func.func @transform_8(%arg0: i32, %arg1: i32) -> (i32, i32, i32) {
    %c0_i32 = arith.constant 0 : i32
    %c0_i32_0 = arith.constant 0 : i32
    %c0_i32_1 = arith.constant 0 : i32
    return %arg1, %c0_i32, %c0_i32_0 : i32, i32, i32
  }
  func.func @transform_9(%arg0: i32, %arg1: i32) -> (i32, i32, i32) {
    %c0_i32 = arith.constant 0 : i32
    %c0_i32_0 = arith.constant 0 : i32
    %c0_i32_1 = arith.constant 0 : i32
    return %arg1, %c0_i32, %c0_i32_0 : i32, i32, i32
  }
  func.func @transform_10(%arg0: i32, %arg1: i32) -> (i32, i32, i32) {
    %c0_i32 = arith.constant 0 : i32
    %c0_i32_0 = arith.constant 0 : i32
    %c0_i32_1 = arith.constant 0 : i32
    return %arg1, %c0_i32, %c0_i32_0 : i32, i32, i32
  }
  func.func @transform_11(%arg0: i32, %arg1: i32) -> (i32, i32, i32) {
    %c0_i32 = arith.constant 0 : i32
    %c0_i32_0 = arith.constant 0 : i32
    %c0_i32_1 = arith.constant 0 : i32
    return %arg1, %c0_i32, %c0_i32_0 : i32, i32, i32
  }
  func.func @transform_12(%arg0: i32, %arg1: i32) -> (i32, i32, i32) {
    %c0_i32 = arith.constant 0 : i32
    %c0_i32_0 = arith.constant 0 : i32
    %c0_i32_1 = arith.constant 0 : i32
    return %arg1, %c0_i32, %c0_i32_0 : i32, i32, i32
  }
  func.func @transform_13(%arg0: i32, %arg1: i32) -> (i32, i32) {
    %c0_i32 = arith.constant 0 : i32
    %c0_i32_0 = arith.constant 0 : i32
    %c0_i32_1 = arith.constant 0 : i32
    return %c0_i32, %c0_i32_0 : i32, i32
  }
  func.func @transform_14(%arg0: i32, %arg1: i32) -> (i32, i32) {
    %c0_i32 = arith.constant 0 : i32
    %c0_i32_0 = arith.constant 0 : i32
    %c0_i32_1 = arith.constant 0 : i32
    return %c0_i32, %c0_i32_0 : i32, i32
  }
  func.func @transform_15(%arg0: i32, %arg1: i32) -> (i32, i32) {
    %c0_i32 = arith.constant 0 : i32
    %c0_i32_0 = arith.constant 0 : i32
    %c0_i32_1 = arith.constant 0 : i32
    return %c0_i32, %c0_i32_0 : i32, i32
  }
  func.func @transform_16(%arg0: i32, %arg1: i32) -> (i32, i32) {
    %c0_i32 = arith.constant 0 : i32
    %c0_i32_0 = arith.constant 0 : i32
    %c0_i32_1 = arith.constant 0 : i32
    return %c0_i32, %c0_i32_0 : i32, i32
  }
  func.func @transform_17(%arg0: i32, %arg1: i32) -> (i32, i32, i32) {
    %c0_i32 = arith.constant 0 : i32
    %c0_i32_0 = arith.constant 0 : i32
    %c0_i32_1 = arith.constant 0 : i32
    return %arg0, %c0_i32, %c0_i32_0 : i32, i32, i32
  }
}

</mosaic_0001>

<bundles_post_ra>
// kernel: tpu_custom_call.1
= control target key start
LH: loop header
LB: loop body
LE: loop exit
PB: predicated region body
PF: predicated region fallthrough
CT: control target
= control target key end

     0   :  { %s3780_s0 = inlined_call_operand.vmem [shape: f32[2,16,32], index: 0, kind: input, shape index: {}]   ;;  %s3781_s1 = inlined_call_operand.vmem [shape: f32[2,1,32], index: 1, kind: input, shape index: {}]   ;;  %s3782_s2 = inlined_call_operand.vmem [shape: f32[2,1,32], index: 2, kind: input, shape index: {}]   ;;  %s3783_s3 = inlined_call_operand.vmem [shape: bf16[2,32,96], index: 3, kind: input, shape index: {}]   ;;  %s3784_s4 = inlined_call_operand.vmem [shape: f32[2,1,96], index: 4, kind: input, shape index: {}]   ;;  %s3785_s5 = inlined_call_operand.vmem [shape: bf16[2,32,32], index: 5, kind: input, shape index: {}]   ;;  %s3786_s6 = inlined_call_operand.vmem [shape: f32[2,1,32], index: 6, kind: input, shape index: {}]   ;;  %s3787_s7 = inlined_call_operand.vmem [shape: f32[2,1,32], index: 7, kind: input, shape index: {}]   ;;  %s3788_s8 = inlined_call_operand.vmem [shape: f32[2,1,32], index: 8, kind: input, shape index: {}]   ;;  %s3789_s9 = inlined_call_operand.vmem [shape: bf16[2,32,128], index: 9, kind: input, shape index: {}]   ;;  %s3790_s10 = inlined_call_operand.vmem [shape: f32[2,1,128], index: 10, kind: input, shape index: {}]   ;;  %s3791_s11 = inlined_call_operand.vmem [shape: bf16[2,128,32], index: 11, kind: input, shape index: {}]   ;;  %s3792_s12 = inlined_call_operand.vmem [shape: f32[2,1,32], index: 12, kind: input, shape index: {}]   ;;  %s3793_s13 = inlined_call_operand.vmem [shape: f32[1,32], index: 13, kind: input, shape index: {}]   ;;  %s3794_s14 = inlined_call_operand.vmem [shape: f32[1,32], index: 14, kind: input, shape index: {}]   ;;  %s3795_s15 = inlined_call_operand.vmem [shape: bf16[32,128], index: 15, kind: input, shape index: {}]   ;;  %s3796_s16 = inlined_call_operand.vmem [shape: f32[1,128], index: 16, kind: input, shape index: {}]   ;;  %s3797_s17 = inlined_call_operand.hbm [shape: f32[1,2,128], index: 17, kind: output, shape index: {}]  }
   0x1   :  { %3802 = sst [smem:[#allocation10_spill]] %s3780_s0 }
   0x2   :  { %3803 = sst [smem:[#allocation11_spill]] %s3781_s1 }
   0x3   :  { %3804 = sst [smem:[#allocation12_spill]] %s3783_s3 }
   0x4   :  { %3805 = sst [smem:[#allocation13_spill]] %s3785_s5 }
   0x5   :  { %3806 = sst [smem:[#allocation14_spill]] %s3793_s13 }
   0x6   :  { %3807 = sst [smem:[#allocation15_spill]] %s3794_s14 }
   0x7   :  { %3808 = sst [smem:[#allocation16_spill]] %s3796_s16 }
   0x8   :  { %3809 = sst [smem:[#allocation17_spill]] %s3797_s17 }
   0x9   :  { %22 = vsyncpa [#allocation5], 0  ;;  %s3238_s24 = smov 0   ;;  %s3240_s25 = smov 0  }
   0xa   :  { %s3242_s26 = smov 0  }
   0xb LB: > { %3810 = sst [smem:[#allocation7_spill]] %s3123_s25  ;;  %s37_s28 = sadd.s32 1, %s3123_s25  ;;  %s3127_s26 = sphi %s3242_s26, %s28_s26   ;;  %s3123_s25 = sphi %s3240_s25, %s3831_s25   ;;  %s3119_s24 = sphi %s3238_s24, %s3830_s24  }
   0xc   : > { %3811 = sst [smem:[#allocation8_spill]] %s3127_s26  ;;  %p38_p0 = scmp.ge.s32.totalorder %s37_s28, 2 }
   0xd   : > { %p2640_p1 = scmp.ge.s32.totalorder %s3127_s26, 1  ;;  %p606_p2 = scmp.lt.s32.totalorder %s3127_s26, 3 }
   0xe   : > { %s3833_s28 = smov (%p38_p0, %s37_s28), 0 }
   0xf   : > { %3812 = sst [smem:[#allocation9_spill]] %s3833_s28  ;;  %p607_p3 = pnand %p2640_p1, %p606_p2 }
  0x10   : > { %p705_p4 = scmp.lt.s32.totalorder (!%p607_p3), %s3119_s24, 1  ;;  %s3814_s3 = sld [smem:[#allocation12_spill]] (!%p607_p3) }
  0x11   : > { %610 = sbr.rel (%p607_p3) target bundleno = 3241 (0xca9), region = 88  ;;  %s3815_s5 = sld [smem:[#allocation13_spill]] (!%p607_p3) }
  0x12   : > { %p2649_p5 = scmp.ne.s32.totalorder (!%p607_p3), %s3119_s24, 0 }
  0x18   : > { %s3261_s29 = scalar_select %p705_p4, %s3119_s24, 1 }
  0x19   : > { %753 = sbr.rel (%p2649_p5) target bundleno = 34 (0x22), region = 92  ;;  %s3816_s0 = sld [smem:[#allocation10_spill]] (!%p2649_p5)  ;;  %vm756_vm0 = vcmask (!%p2649_p5), 261120  }
  0x1a   : > { %s2707_s22 = sshll.u32 %s3261_s29, 4  ;;  %s729_s14 = scalar_lea.vmem %s3787_s7, %s3261_s29 }
  0x1b   : > { %s3279_s25 = scalar_lea.vmem %s3814_s3, %s2707_s22  ;;  %s3284_s16 = scalar_lea.vmem %s3815_s5, %s2707_s22 }
  0x1c   : > { %s732_s28 = scalar_lea.vmem %s3788_s8, %s3261_s29  ;;  %s3301_s3 = scalar_lea.vmem %s3789_s9, %s2707_s22 }
  0x1d   : > { %s740_s5 = scalar_lea.vmem %s3790_s10, %s3261_s29  ;;  %s2710_s13 = sshll.u32 %s3261_s29, 6 }
  0x1e   : > { %s3311_s1 = scalar_lea.vmem %s3791_s11, %s2710_s13  ;;  %s748_s27 = scalar_lea.vmem %s3792_s12, %s3261_s29 }
  0x1f   : > { %v754_v0 = vld [vmem:[%s3816_s0] sm:$0xff] (!%p2649_p5)  ;;  %v755_v1 = vld [vmem:[%s3816_s0 + $0x8] sm:$0xff] (!%p2649_p5)  ;;  %v2650_v2 = vld [vmem:[%s3816_s0 + $0x10] sm:$0xff] (!%p2649_p5) }
  0x20   : > { %757 = vst.msk [vmem:[#allocation2] sm:$0xff] %vm756_vm0, %v754_v0  ;;  %758 = vst.msk [vmem:[#allocation2 + $0x8] sm:$0xff] %vm756_vm0, %v755_v1  ;;  %v2651_v3 = vld [vmem:[%s3816_s0 + $0x18] sm:$0xff] }
  0x21   : > { %762 = vst.msk [vmem:[#allocation2 + $0x10] sm:$0xff] %vm756_vm0, %v2650_v2  ;;  %763 = vst.msk [vmem:[#allocation2 + $0x18] sm:$0xff] %vm756_vm0, %v2651_v3 }
  0x22 PF: > { %vm774_vm1 = vcmask 261120   ;;  %v2965_v32 = vld [vmem:[%s3279_s25] sm:$0xff]   ;;  %v2966_v33 = vld [vmem:[%s3279_s25 + $0x8] sm:$0xff]   ;;  %s3817_s20 = sld [smem:[#allocation11_spill]]  ;;  %s3819_s17 = scalar_lea.vmem %s3782_s2, %s3261_s29  ;;  %v3129_v2 = vmov 0.0   ;;  %vm3130_vm2 = vmmov 0  }
  0x23   : > { %2768 = vmatprep.subr.bf16.mxu0 %v2965_v32  ;;  %v2653_v54 = vld [vmem:[%s3819_s17] ss:$0 sm:$0xff]  ;;  %2788 = vmatprep.subr.bf16.mxu1 %v3129_v2  ;;  %s3820_s13 = scalar_lea.vmem %s3784_s4, %s3261_s29  ;;  %s3131_s18 = smov 88   ;;  %vm933_vm3 = vcmask 64512   ;;  %vm981_vm5 = vcmask 130048   ;;  %vm1433_vm6 = vcmask 195584  }
  0x24   : > { %2769 = vmatpush3.bf16.msra.mxu0 %v2965_v32  ;;  %2790 = vmatprep.mubr.msk.bf16.mxu1 %vm3130_vm2, %v3129_v2  ;;  %s3132_s25 = smov 96   ;;  %s3133_s21 = smov 120  }
  0x25   : > { %2770 = vmatprep.subr.bf16.mxu0 %v2966_v33  ;;  %s3136_s22 = smov 104   ;;  %s3137_s30 = smov 72  }
  0x26   : > { %s3138_s17 = smov 64   ;;  %s3139_s26 = smov 56  }
  0x27   : > { %s3140_s19 = smov 48   ;;  %p2696_p6 = scmp.ne.s32.totalorder %s3119_s24, 1 }
  0x28   : > { %v766_v5 = vld [vmem:[#allocation2 + $0x10] sm:$0xff]  ;;  %v767_v9 = vld [vmem:[#allocation2 + $0x18] sm:$0xff]  ;;  %2771 = vmatpush3.bf16.msra.mxu0 %v2966_v33  ;;  %s3818_s23 = scalar_lea.vmem %s3817_s20, %s3261_s29  ;;  %s3134_s20 = smov 112   ;;  %vm2354_vm7 = vcmask (!%p2696_p6), 1040384   ;;  %vm2358_vm8 = vcmask (!%p2696_p6), 254976   ;;  %vm3146_vm9 = vmmov (!%p2696_p6), 0  }
  0x29   : > { %v764_v4 = vld [vmem:[#allocation2] sm:$0xff]  ;;  %v765_v6 = vld [vmem:[#allocation2 + $0x8] sm:$0xff]  ;;  %v781_v8 = vsel %vm774_vm1, %v766_v5, 0.0  ;;  %v784_v11 = vsel %vm774_vm1, %v767_v9, 0.0  ;;  %2776 = vmatprep.subr.bf16.mxu0 %v3129_v2 }
  0x2a   : > { %v775_v7 = vsel %vm774_vm1, %v764_v4, 0.0  ;;  %782 = vadd.xlane.f32.xlu1 %v781_v8  ;;  %v778_v10 = vsel %vm774_vm1, %v765_v6, 0.0  ;;  %v2652_v48 = vld [vmem:[%s3818_s23] ss:$0 sm:$0xff]  ;;  %s3135_s23 = smov 80  }
  0x2b   : > { %776 = vadd.xlane.f32.xlu0 %v775_v7 }
  0x2e   : > { %785 = vadd.xlane.f32.xlu1 %v784_v11 }
  0x2f   : > { %779 = vadd.xlane.f32.xlu0 %v778_v10 }
  0xb7   : > { %v783_v13 = vpop.xlane.xlu1 %782 }
  0xb8   : > { %v777_v12 = vpop.xlane.xlu0 %776  ;;  %v790_v15 = vmul.f32 0.03125, %v783_v13 }
  0xb9   : > { %v788_v14 = vmul.f32 0.03125, %v777_v12 }
  0xba   : > { %v794_v17 = vsub.f32 %v766_v5, %v790_v15 }
  0xbb   : > { %v792_v16 = vsub.f32 %v764_v4, %v788_v14  ;;  %v786_v19 = vpop.xlane.xlu1 %785  ;;  %v2654_v4 = vld [vmem:[%s3820_s13] ss:$0 sm:$0xff]  ;;  %s3141_s13 = smov 40  }
  0xbc   : > { %v780_v18 = vpop.xlane.xlu0 %779  ;;  %v791_v21 = vmul.f32 0.03125, %v786_v19  ;;  %v798_v23 = vmul.f32 %v794_v17, %v794_v17 }
  0xbd   : > { %v789_v20 = vmul.f32 0.03125, %v780_v18  ;;  %v796_v22 = vmul.f32 %v792_v16, %v792_v16 }
  0xbe   : > { %v795_v25 = vsub.f32 %v767_v9, %v791_v21  ;;  %v806_v27 = vsel %vm774_vm1, %v798_v23, 0.0 }
  0xbf   : > { %v793_v24 = vsub.f32 %v765_v6, %v789_v20  ;;  %v800_v26 = vsel %vm774_vm1, %v796_v22, 0.0 }
  0xc0   : > { %801 = vadd.xlane.f32.xlu0 %v800_v26  ;;  %v799_v29 = vmul.f32 %v795_v25, %v795_v25 }
  0xc1   : > { %v797_v28 = vmul.f32 %v793_v24, %v793_v24 }
  0xc2   : > { %v809_v31 = vsel %vm774_vm1, %v799_v29, 0.0 }
  0xc3   : > { %v803_v30 = vsel %vm774_vm1, %v797_v28, 0.0 }
  0xc4   : > { %807 = vadd.xlane.f32.xlu0 %v806_v27  ;;  %804 = vadd.xlane.f32.xlu1 %v803_v30 }
  0xc8   : > { %810 = vadd.xlane.f32.xlu1 %v809_v31 }
 0x14d   : > { %v802_v34 = vpop.xlane.xlu0 %801 }
 0x14e   : > { %v812_v35 = vmul.f32 0.03125, %v802_v34 }
 0x150   : > { %v816_v36 = vadd.f32 1e-05, %v812_v35 }
 0x151   : > { %v805_v37 = vpop.xlane.xlu1 %804  ;;  %v808_v38 = vpop.xlane.xlu0 %807 }
 0x152   : > { %2979 = vrsqrt.f32 %v816_v36  ;;  %v813_v39 = vmul.f32 0.03125, %v805_v37  ;;  %v814_v40 = vmul.f32 0.03125, %v808_v38  ;;  %v768_v37 = vlaneseq }
 0x154   : > { %v817_v41 = vadd.f32 1e-05, %v813_v39  ;;  %v818_v42 = vadd.f32 1e-05, %v814_v40  ;;  %v769_v38 = vand.u32 127, %v768_v37 }
 0x155   : > { %v811_v43 = vpop.xlane.xlu1 %810 }
 0x156   : > { %2981 = vrsqrt.f32 %v817_v41  ;;  %v815_v44 = vmul.f32 0.03125, %v811_v43  ;;  %vm770_vm4 = vcmp.ge.s32.totalorder %v769_v38, 9 }
 0x157   : > { %2983 = vrsqrt.f32 %v818_v42  ;;  %v3424_v39 = vsel %vm770_vm4, -1e+30, %v3129_v2 }
 0x158   : > { %v819_v45 = vadd.f32 1e-05, %v815_v44 }
 0x15a   : > { %2985 = vrsqrt.f32 %v819_v45 }
 0x15c   : > { %v2980_v46 = vpop.eup %2979 }
 0x15d   : > { %v824_v47 = vmul.f32 %v2980_v46, %v792_v16 }
 0x15f   : > { %v834_v52 = vmul.f32 %v2652_v48, %v824_v47 }
 0x160   : > { %v2982_v49 = vpop.eup %2981 }
 0x161   : > { %v2984_v50 = vpop.eup %2983  ;;  %v825_v51 = vmul.f32 %v2982_v49, %v793_v24  ;;  %v844_v58 = vadd.f32 %v2653_v54, %v834_v52 }
 0x162   : > { %v826_v53 = vmul.f32 %v2984_v50, %v794_v17 }
 0x163   : > { %v835_v55 = vmul.f32 %v2652_v48, %v825_v51 }
 0x164   : > { %v2986_v56 = vpop.eup %2985  ;;  %v836_v60 = vmul.f32 %v2652_v48, %v826_v53 }
 0x165   : > { %v827_v57 = vmul.f32 %v2986_v56, %v795_v25  ;;  %v845_v59 = vadd.f32 %v2653_v54, %v835_v55 }
 0x166   : > { %v846_v63 = vadd.f32 %v2653_v54, %v836_v60 }
 0x167   : > { %v848_v61 = vpack.c.bf16 %v845_v59, %v844_v58  ;;  %v837_v62 = vmul.f32 %v2652_v48, %v827_v57 }
 0x169   : > { %2772 = vmatprep.mubr.msk.bf16.mxu0 %vm774_vm1, %v848_v61  ;;  %v847_v0 = vadd.f32 %v2653_v54, %v837_v62 }
 0x16b   : > { %v849_v1 = vpack.c.bf16 %v847_v0, %v846_v63 }
 0x16d   : > { %2773 = vmatmul.mubr.msk.bf16.vlgmr.msra.gmra.mrb[0].mxu0 %vm774_vm1, %v849_v1 }
 0x16e   : > { %2778 = vmatprep.mubr.msk.bf16.mxu0 %vm3130_vm2, %v3129_v2 }
 0x240   : > { %v2774_v3 = vpop.f32.mrb[0].mxu0 }
 0x241   : > { %v913_v5 = vpop.f32.mrb[1].mxu0  ;;  %v922_v7 = vadd.f32 %v2774_v3, %v2654_v4 }
 0x242   : > { %v2775_v6 = vpop.f32.mrb[2].mxu0  ;;  %v914_v10 = vadd.f32 %v2654_v4, %v913_v5 }
 0x243   : > { %v925_v8 = vadd.f32 %v2775_v6, %v2654_v4  ;;  %v916_v9 = vpop.f32.mrb[3].mxu0 }
 0x244   : > { %v917_v11 = vadd.f32 %v2654_v4, %v916_v9 }
 0x245   : > { %v3363_v12 = vpack.c.bf16 %v925_v8, %v922_v7 }
 0x246   : > { %v3365_v13 = vpack.c.bf16 %v917_v11, %v914_v10 }
 0x248   : > { %1055 = vrot.lane.b32.xlu1 %v3365_v13, %s3131_s18  ;;  %931 = vrot.lane.b32.xlu0 %v3365_v13, %s3132_s25 }
 0x24c   : > { %1053 = vrot.lane.b32.xlu1 %v3365_v13, %s3133_s21  ;;  %1175 = vrot.lane.b32.xlu0 %v3365_v13, %s3134_s20 }
 0x250   : > { %1177 = vrot.lane.b32.xlu1 %v3365_v13, %s3135_s23  ;;  %1297 = vrot.lane.b32.xlu0 %v3365_v13, %s3136_s22 }
 0x254   : > { %1299 = vrot.lane.b32.xlu1 %v3365_v13, %s3137_s30  ;;  %1561 = vrot.lane.b32.xlu0 %v3363_v12, %s3131_s18  ;;  %s3142_s18 = smov 8  }
 0x258   : > { %1439 = vrot.lane.b32.xlu1 %v3363_v12, %s3132_s25  ;;  %1683 = vrot.lane.b32.xlu0 %v3363_v12, %s3135_s23  ;;  %s3143_s25 = smov 16   ;;  %s3821_s23 = scalar_lea.vmem %s3786_s6, %s3261_s29 }
 0x25c   : > { %1559 = vrot.lane.b32.xlu1 %v3363_v12, %s3133_s21  ;;  %1805 = vrot.lane.b32.xlu0 %v3363_v12, %s3137_s30  ;;  %s3144_s21 = smov 24  }
 0x260   : > { %1681 = vrot.lane.b32.xlu1 %v3363_v12, %s3134_s20  ;;  %1005 = vrot.lane.b32.xlu0 %v3365_v13, %s3138_s17 }
 0x264   : > { %1803 = vrot.lane.b32.xlu1 %v3363_v12, %s3136_s22 }
 0x2ba   : > { %v1056_v14 = vpop.permute.xlu1 %1055  ;;  %v932_v15 = vpop.permute.xlu0 %931 }
 0x2bb   : > { %v938_v16 = vsel %vm933_vm3, %v932_v15, 0  ;;  %v1061_v17 = vsel %vm933_vm3, %v1056_v14, 0 }
 0x2bc   : > { %2777 = vmatpush3.bf16.xpose.msra.mxu0 %v938_v16  ;;  %2789 = vmatpush3.bf16.xpose.msra.mxu1 %v1061_v17 }
 0x2bd   : > { %2800 = vmatprep.subr.bf16.mxu1 %v3129_v2  ;;  %2782 = vmatprep.subr.bf16.mxu0 %v3129_v2 }
 0x2be   : > { %v1054_v18 = vpop.permute.xlu1 %1053  ;;  %v1176_v19 = vpop.permute.xlu0 %1175 }
 0x2c2   : > { %v1178_v20 = vpop.permute.xlu1 %1177  ;;  %v1298_v21 = vpop.permute.xlu0 %1297 }
 0x2c3   : > { %v1183_v22 = vsel %vm933_vm3, %v1178_v20, 0  ;;  %2779 = vmatmul.mubr.msk.bf16.vlgmr.msra.gmra.mrb[4].mxu0 %vm933_vm3, %v3365_v13  ;;  %2791 = vmatmul.mubr.msk.bf16.vlgmr.msra.gmra.mrb[0].mxu1 %vm933_vm3, %v1054_v18 }
 0x2c4   : > { %2801 = vmatpush3.bf16.xpose.msra.mxu1 %v1183_v22  ;;  %2802 = vmatprep.mubr.msk.bf16.mxu1 %vm3130_vm2, %v3129_v2 }
 0x2c5   : > { %2812 = vmatprep.subr.bf16.mxu1 %v3129_v2  ;;  %2784 = vmatprep.mubr.msk.bf16.mxu0 %vm3130_vm2, %v3129_v2 }
 0x2c6   : > { %v1562_v23 = vpop.permute.xlu0 %1561  ;;  %v1300_v24 = vpop.permute.xlu1 %1299 }
 0x2c7   : > { %v1305_v26 = vsel %vm933_vm3, %v1300_v24, 0  ;;  %v1567_v31 = vsel %vm933_vm3, %v1562_v23, 0 }
 0x2ca   : > { %v1684_v25 = vpop.permute.xlu0 %1683  ;;  %v1440_v28 = vpop.permute.xlu1 %1439 }
 0x2cb   : > { %2803 = vmatmul.mubr.msk.bf16.vlgmr.msra.gmra.mrb[4].mxu1 %vm933_vm3, %v1176_v19  ;;  %v1445_v30 = vsel %vm933_vm3, %v1440_v28, 0  ;;  %v1689_v33 = vsel %vm933_vm3, %v1684_v25, 0 }
 0x2cc   : > { %2813 = vmatpush3.bf16.xpose.msra.mxu1 %v1305_v26  ;;  %2814 = vmatprep.mubr.msk.bf16.mxu1 %vm3130_vm2, %v3129_v2 }
 0x2cd   : > { %2824 = vmatprep.subr.bf16.mxu1 %v3129_v2 }
 0x2ce   : > { %v1806_v27 = vpop.permute.xlu0 %1805  ;;  %v1560_v32 = vpop.permute.xlu1 %1559 }
 0x2cf   : > { %v1811_v35 = vsel %vm933_vm3, %v1806_v27, 0 }
 0x2d2   : > { %v1006_v29 = vpop.permute.xlu0 %1005  ;;  %v1682_v34 = vpop.permute.xlu1 %1681 }
 0x2d3   : > { %2783 = vmatpush3.bf16.msra.mxu0 %v1006_v29  ;;  %2815 = vmatmul.mubr.msk.bf16.vlgmr.msra.gmra.mrb[8].mxu1 %vm933_vm3, %v1298_v21 }
 0x2d4   : > { %2825 = vmatpush3.bf16.xpose.msra.mxu1 %v1445_v30  ;;  %2826 = vmatprep.mubr.msk.bf16.mxu1 %vm3130_vm2, %v3129_v2 }
 0x2d5   : > { %2836 = vmatprep.subr.bf16.mxu1 %v3129_v2  ;;  %2794 = vmatprep.subr.bf16.mxu0 %v3129_v2 }
 0x2d6   : > { %v1804_v36 = vpop.permute.xlu1 %1803 }
 0x2db   : > { %2827 = vmatmul.mubr.msk.bf16.vlgmr.msra.gmra.mrb[12].mxu1 %vm933_vm3, %v3363_v12 }
 0x2dc   : > { %2837 = vmatpush3.bf16.xpose.msra.mxu1 %v1567_v31  ;;  %2838 = vmatprep.mubr.msk.bf16.mxu1 %vm3130_vm2, %v3129_v2 }
 0x2dd   : > { %2848 = vmatprep.subr.bf16.mxu1 %v3129_v2 }
 0x2e3   : > { %2839 = vmatmul.mubr.msk.bf16.vlgmr.msra.gmra.mrb[16].mxu1 %vm933_vm3, %v1560_v32 }
 0x2e4   : > { %2849 = vmatpush3.bf16.xpose.msra.mxu1 %v1689_v33  ;;  %2850 = vmatprep.mubr.msk.bf16.mxu1 %vm3130_vm2, %v3129_v2 }
 0x2e5   : > { %2860 = vmatprep.subr.bf16.mxu1 %v3129_v2 }
 0x2eb   : > { %2851 = vmatmul.mubr.msk.bf16.vlgmr.msra.gmra.mrb[20].mxu1 %vm933_vm3, %v1682_v34 }
 0x2ec   : > { %2861 = vmatpush3.bf16.xpose.msra.mxu1 %v1811_v35  ;;  %2862 = vmatprep.mubr.msk.bf16.mxu1 %vm3130_vm2, %v3129_v2 }
 0x2f3   : > { %2863 = vmatmul.mubr.msk.bf16.vlgmr.msra.gmra.mrb[24].mxu1 %vm933_vm3, %v1804_v36 }
 0x396   : > { %v974_v40 = vpop.f32.mrb[4].mxu0  ;;  %v1097_v41 = vpop.f32.mrb[0].mxu1 }
 0x397   : > { %v3427_v42 = vadd.f32 %v974_v40, %v3424_v39  ;;  %v2780_v43 = vpop.f32.mrb[5].mxu0  ;;  %v2792_v44 = vpop.f32.mrb[1].mxu1  ;;  %v3430_v47 = vadd.f32 %v1097_v41, %v3424_v39 }
 0x398   : > { %v977_v45 = vpop.f32.mrb[6].mxu0  ;;  %v1100_v46 = vpop.f32.mrb[2].mxu1 }
 0x399   : > { %v3433_v48 = vadd.f32 %v977_v45, %v3424_v39  ;;  %v2781_v49 = vpop.f32.mrb[7].mxu0  ;;  %v2793_v50 = vpop.f32.mrb[3].mxu1  ;;  %v982_v51 = vsel %vm981_vm5, %v3427_v42, -inf  ;;  %v3440_v53 = vadd.f32 %v1100_v46, %v3424_v39  ;;  %v1104_v54 = vsel %vm981_vm5, %v3430_v47, -inf }
 0x39a   : > { %983 = vmax.xlane.f32.xlu0 %v982_v51 }
 0x39b   : > { %v985_v52 = vsel %vm981_vm5, %v3433_v48, -inf  ;;  %v1107_v60 = vsel %vm981_vm5, %v3440_v53, -inf }
 0x39c   : > { %986 = vmax.xlane.f32.xlu1 %v985_v52 }
 0x39e   : > { %1105 = vmax.xlane.f32.xlu0 %v1104_v54  ;;  %v1219_v55 = vpop.f32.mrb[4].mxu1 }
 0x39f   : > { %v2804_v56 = vpop.f32.mrb[5].mxu1  ;;  %v3445_v58 = vadd.f32 %v1219_v55, %v3424_v39 }
 0x3a0   : > { %v1222_v57 = vpop.f32.mrb[6].mxu1 }
 0x3a1   : > { %v2805_v59 = vpop.f32.mrb[7].mxu1  ;;  %v1226_v61 = vsel %vm981_vm5, %v3445_v58, -inf  ;;  %v3488_v34 = vadd.f32 %v1222_v57, %v3424_v39 }
 0x3a2   : > { %1108 = vmax.xlane.f32.xlu0 %v1107_v60 }
 0x3a3   : > { %v1229_v36 = vsel %vm981_vm5, %v3488_v34, -inf }
 0x3a6   : > { %1227 = vmax.xlane.f32.xlu0 %v1226_v61  ;;  %v1341_v62 = vpop.f32.mrb[8].mxu1 }
 0x3a7   : > { %v3452_v63 = vadd.f32 %v1341_v62, %v3424_v39  ;;  %v2816_v0 = vpop.f32.mrb[9].mxu1 }
 0x3a8   : > { %v1344_v1 = vpop.f32.mrb[10].mxu1 }
 0x3a9   : > { %v2817_v3 = vpop.f32.mrb[11].mxu1  ;;  %v1348_v4 = vsel %vm981_vm5, %v3452_v63, -inf  ;;  %v3491_v35 = vadd.f32 %v1344_v1, %v3424_v39 }
 0x3aa   : > { %1349 = vmax.xlane.f32.xlu0 %v1348_v4 }
 0x3ab   : > { %v1351_v38 = vsel %vm981_vm5, %v3491_v35, -inf }
 0x3ad   : > { %1127 = vrot.lane.b32.xlu1 %v3365_v13, %s3139_s26 }
 0x3ae   : > { %v1481_v5 = vpop.f32.mrb[12].mxu1 }
 0x3af   : > { %v3459_v6 = vadd.f32 %v1481_v5, %v3424_v39  ;;  %v2828_v7 = vpop.f32.mrb[13].mxu1 }
 0x3b0   : > { %v1484_v8 = vpop.f32.mrb[14].mxu1 }
 0x3b1   : > { %v2829_v9 = vpop.f32.mrb[15].mxu1  ;;  %v1488_v10 = vsel %vm981_vm5, %v3459_v6, -inf  ;;  %v3496_v37 = vadd.f32 %v1484_v8, %v3424_v39 }
 0x3b2   : > { %1489 = vmax.xlane.f32.xlu0 %v1488_v10 }
 0x3b3   : > { %v1491_v40 = vsel %vm981_vm5, %v3496_v37, -inf }
 0x3b6   : > { %v1603_v11 = vpop.f32.mrb[16].mxu1 }
 0x3b7   : > { %v3464_v14 = vadd.f32 %v1603_v11, %v3424_v39  ;;  %v2840_v15 = vpop.f32.mrb[17].mxu1 }
 0x3b8   : > { %v1606_v16 = vpop.f32.mrb[18].mxu1 }
 0x3b9   : > { %v3467_v17 = vadd.f32 %v1606_v16, %v3424_v39  ;;  %v2841_v18 = vpop.f32.mrb[19].mxu1  ;;  %v1610_v19 = vsel %vm981_vm5, %v3464_v14, -inf }
 0x3ba   : > { %1611 = vmax.xlane.f32.xlu0 %v1610_v19 }
 0x3bb   : > { %v1613_v41 = vsel %vm981_vm5, %v3467_v17, -inf }
 0x3be   : > { %v1725_v20 = vpop.f32.mrb[20].mxu1 }
 0x3bf   : > { %v3472_v21 = vadd.f32 %v1725_v20, %v3424_v39  ;;  %v2852_v22 = vpop.f32.mrb[21].mxu1 }
 0x3c0   : > { %v1728_v23 = vpop.f32.mrb[22].mxu1 }
 0x3c1   : > { %v3475_v24 = vadd.f32 %v1728_v23, %v3424_v39  ;;  %v2853_v25 = vpop.f32.mrb[23].mxu1  ;;  %v1732_v26 = vsel %vm981_vm5, %v3472_v21, -inf }
 0x3c2   : > { %1733 = vmax.xlane.f32.xlu0 %v1732_v26 }
 0x3c6   : > { %v1847_v27 = vpop.f32.mrb[24].mxu1 }
 0x3c7   : > { %v3480_v28 = vadd.f32 %v1847_v27, %v3424_v39  ;;  %v2864_v29 = vpop.f32.mrb[25].mxu1 }
 0x3c8   : > { %v1850_v30 = vpop.f32.mrb[26].mxu1 }
 0x3c9   : > { %v3483_v31 = vadd.f32 %v1850_v30, %v3424_v39  ;;  %v2865_v32 = vpop.f32.mrb[27].mxu1  ;;  %v1854_v33 = vsel %vm981_vm5, %v3480_v28, -inf  ;;  %v1735_v39 = vsel %vm981_vm5, %v3475_v24, -inf }
 0x3ca   : > { %1855 = vmax.xlane.f32.xlu0 %v1854_v33 }
 0x3cb   : > { %v1857_v43 = vsel %vm981_vm5, %v3483_v31, -inf }
 0x3d1   : > { %1230 = vmax.xlane.f32.xlu1 %v1229_v36 }
 0x3d5   : > { %1352 = vmax.xlane.f32.xlu1 %v1351_v38 }
 0x3d9   : > { %1492 = vmax.xlane.f32.xlu1 %v1491_v40 }
 0x3dd   : > { %1614 = vmax.xlane.f32.xlu1 %v1613_v41 }
 0x3e0   : > { %1249 = vrot.lane.b32.xlu0 %v3365_v13, %s3140_s19 }
 0x3e1   : > { %1736 = vmax.xlane.f32.xlu1 %v1735_v39 }
 0x3e5   : > { %1858 = vmax.xlane.f32.xlu1 %v1857_v43 }
 0x3f6   : > { %1371 = vrot.lane.b32.xlu1 %v3365_v13, %s3141_s13 }
 0x427   : > { %v984_v44 = vpop.xlane.xlu0 %983 }
 0x428   : > { %v988_v45 = vsub.f32 %v3427_v42, %v984_v44 }
 0x429   : > { %v987_v46 = vpop.xlane.xlu1 %986 }
 0x42a   : > { %v990_v49 = vmul.f32 1.442695, %v988_v45  ;;  %v989_v50 = vsub.f32 %v3433_v48, %v987_v46 }
 0x42b   : > { %v1106_v51 = vpop.xlane.xlu0 %1105 }
 0x42c   : > { %2987 = vpow2.f32 %v990_v49  ;;  %v992_v52 = vmul.f32 1.442695, %v989_v50  ;;  %v1110_v54 = vsub.f32 %v3430_v47, %v1106_v51 }
 0x42d   : > { %v3542_v10 = vpop.permute.xlu1 %1127 }
 0x42e   : > { %2989 = vpow2.f32 %v992_v52  ;;  %v1112_v55 = vmul.f32 1.442695, %v1110_v54 }
 0x42f   : > { %v1109_v56 = vpop.xlane.xlu0 %1108 }
 0x430   : > { %2991 = vpow2.f32 %v1112_v55  ;;  %v1111_v57 = vsub.f32 %v3440_v53, %v1109_v56 }
 0x432   : > { %v1114_v59 = vmul.f32 1.442695, %v1111_v57 }
 0x433   : > { %v1228_v13 = vpop.xlane.xlu0 %1227 }
 0x434   : > { %2993 = vpow2.f32 %v1114_v59  ;;  %v1232_v42 = vsub.f32 %v3445_v58, %v1228_v13 }
 0x436   : > { %v3517_v60 = vpop.eup %2987  ;;  %v1234_v61 = vmul.f32 1.442695, %v1232_v42 }
 0x437   : > { %v1350_v48 = vpop.xlane.xlu0 %1349  ;;  %v994_v62 = vsel %vm981_vm5, %v3517_v60, 0.0 }
 0x438   : > { %v3521_v0 = vpop.eup %2989  ;;  %2995 = vpow2.f32 %v1234_v61  ;;  %v1354_v47 = vsub.f32 %v3452_v63, %v1350_v48  ;;  %995 = vadd.xlane.f32.xlu0 %v994_v62 }
 0x439   : > { %v997_v53 = vsel %vm981_vm5, %v3521_v0, 0.0 }
 0x43a   : > { %v3526_v1 = vpop.eup %2991  ;;  %v1356_v3 = vmul.f32 1.442695, %v1354_v47  ;;  %998 = vadd.xlane.f32.xlu1 %v997_v53 }
 0x43b   : > { %v1116_v58 = vsel %vm981_vm5, %v3526_v1, 0.0 }
 0x43c   : > { %2997 = vpow2.f32 %v1356_v3  ;;  %1117 = vadd.xlane.f32.xlu0 %v1116_v58 }
 0x43e   : > { %v3530_v4 = vpop.eup %2993 }
 0x43f   : > { %v1119_v5 = vsel %vm981_vm5, %v3530_v4, 0.0  ;;  %v1490_v11 = vpop.xlane.xlu0 %1489 }
 0x440   : > { %1120 = vadd.xlane.f32.xlu1 %v1119_v5  ;;  %v1494_v19 = vsub.f32 %v3459_v6, %v1490_v11 }
 0x442   : > { %v3534_v63 = vpop.eup %2995  ;;  %v1496_v26 = vmul.f32 1.442695, %v1494_v19 }
 0x443   : > { %v1238_v7 = vsel %vm981_vm5, %v3534_v63, 0.0 }
 0x444   : > { %1239 = vadd.xlane.f32.xlu0 %v1238_v7 }
 0x446   : > { %v3538_v8 = vpop.eup %2997 }
 0x447   : > { %v1360_v9 = vsel %vm981_vm5, %v3538_v8, 0.0  ;;  %v1612_v18 = vpop.xlane.xlu0 %1611 }
 0x448   : > { %1361 = vadd.xlane.f32.xlu0 %v1360_v9  ;;  %v1616_v30 = vsub.f32 %v3464_v14, %v1612_v18 }
 0x44a   : > { %v1618_v38 = vmul.f32 1.442695, %v1616_v30 }
 0x44f   : > { %v1734_v25 = vpop.xlane.xlu0 %1733 }
 0x457   : > { %v1856_v33 = vpop.xlane.xlu0 %1855 }
 0x458   : > { %v1860_v6 = vsub.f32 %v3480_v28, %v1856_v33 }
 0x45b   : > { %v1250_v3 = vpop.permute.xlu0 %1249 }
 0x45e   : > { %v1231_v15 = vpop.xlane.xlu1 %1230  ;;  %1511 = vrot.lane.b32.xlu0 %v3363_v12, %s3138_s17 }
 0x45f   : > { %v1233_v16 = vsub.f32 %v3488_v34, %v1231_v15 }
 0x461   : > { %v1236_v20 = vmul.f32 1.442695, %v1233_v16 }
 0x462   : > { %v1353_v22 = vpop.xlane.xlu1 %1352 }
 0x463   : > { %2999 = vpow2.f32 %v1236_v20  ;;  %v1355_v23 = vsub.f32 %v3491_v35, %v1353_v22  ;;  %v1738_v35 = vsub.f32 %v3472_v21, %v1734_v25 }
 0x465   : > { %v1358_v27 = vmul.f32 1.442695, %v1355_v23  ;;  %v1740_v45 = vmul.f32 1.442695, %v1738_v35 }
 0x466   : > { %v1493_v29 = vpop.xlane.xlu1 %1492 }
 0x467   : > { %3001 = vpow2.f32 %v1358_v27  ;;  %v1495_v32 = vsub.f32 %v3496_v37, %v1493_v29  ;;  %v1862_v37 = vmul.f32 1.442695, %v1860_v6 }
 0x468   : > { %3003 = vpow2.f32 %v1496_v26 }
 0x469   : > { %v1498_v34 = vmul.f32 1.442695, %v1495_v32 }
 0x46a   : > { %v1615_v36 = vpop.xlane.xlu1 %1614 }
 0x46b   : > { %v1617_v40 = vsub.f32 %v3467_v17, %v1615_v36  ;;  %3005 = vpow2.f32 %v1498_v34 }
 0x46c   : > { %3007 = vpow2.f32 %v1618_v38 }
 0x46d   : > { %v3553_v41 = vpop.eup %2999  ;;  %v1620_v39 = vmul.f32 1.442695, %v1617_v40 }
 0x46e   : > { %v1737_v43 = vpop.xlane.xlu1 %1736  ;;  %v1241_v14 = vsel %vm981_vm5, %v3553_v41, 0.0 }
 0x46f   : > { %1242 = vadd.xlane.f32.xlu1 %v1241_v14  ;;  %3009 = vpow2.f32 %v1620_v39  ;;  %v1739_v28 = vsub.f32 %v3475_v24, %v1737_v43 }
 0x470   : > { %3011 = vpow2.f32 %v1862_v37 }
 0x471   : > { %v3558_v44 = vpop.eup %3001  ;;  %3013 = vpow2.f32 %v1740_v45  ;;  %v1742_v49 = vmul.f32 1.442695, %v1739_v28 }
 0x472   : > { %v1859_v17 = vpop.xlane.xlu1 %1858  ;;  %v1363_v46 = vsel %vm981_vm5, %v3558_v44, 0.0  ;;  %v3563_v21 = vpop.eup %3003 }
 0x473   : > { %1364 = vadd.xlane.f32.xlu1 %v1363_v46  ;;  %v1861_v50 = vsub.f32 %v3483_v31, %v1859_v17  ;;  %v1500_v51 = vsel %vm981_vm5, %v3563_v21, 0.0  ;;  %3015 = vpow2.f32 %v1742_v49 }
 0x475   : > { %v3568_v52 = vpop.eup %3005  ;;  %v1864_v24 = vmul.f32 1.442695, %v1861_v50 }
 0x476   : > { %v3570_v54 = vpop.eup %3007  ;;  %v1503_v55 = vsel %vm981_vm5, %v3568_v52, 0.0  ;;  %v1372_v58 = vpop.permute.xlu1 %1371 }
 0x477   : > { %1501 = vadd.xlane.f32.xlu1 %v1500_v51  ;;  %v1622_v57 = vsel %vm981_vm5, %v3570_v54, 0.0  ;;  %3017 = vpow2.f32 %v1864_v24 }
 0x479   : > { %v3574_v56 = vpop.eup %3009 }
 0x47a   : > { %v3578_v31 = vpop.eup %3011  ;;  %v1625_v59 = vsel %vm981_vm5, %v3574_v56, 0.0 }
 0x47b   : > { %1504 = vadd.xlane.f32.xlu1 %v1503_v55  ;;  %v3582_v13 = vpop.eup %3013  ;;  %v1866_v42 = vsel %vm981_vm5, %v3578_v31, 0.0 }
 0x47c   : > { %v1744_v61 = vsel %vm981_vm5, %v3582_v13, 0.0 }
 0x47d   : > { %1623 = vadd.xlane.f32.xlu0 %v1622_v57  ;;  %v3588_v48 = vpop.eup %3015 }
 0x47e   : > { %v1747_v62 = vsel %vm981_vm5, %v3588_v48, 0.0 }
 0x47f   : > { %1626 = vadd.xlane.f32.xlu1 %v1625_v59 }
 0x481   : > { %1867 = vadd.xlane.f32.xlu0 %v1866_v42  ;;  %v3592_v47 = vpop.eup %3017 }
 0x482   : > { %v1869_v53 = vsel %vm981_vm5, %v3592_v47, 0.0 }
 0x483   : > { %1745 = vadd.xlane.f32.xlu1 %v1744_v61 }
 0x487   : > { %1748 = vadd.xlane.f32.xlu1 %v1747_v62 }
 0x48b   : > { %1870 = vadd.xlane.f32.xlu1 %v1869_v53 }
 0x497   : > { %1755 = vrot.lane.b32.xlu0 %v3363_v12, %s3140_s19 }
 0x49b   : > { %1877 = vrot.lane.b32.xlu0 %v3363_v12, %s3141_s13 }
 0x49c   : > { %1633 = vrot.lane.b32.xlu1 %v3363_v12, %s3139_s26 }
 0x4c5   : > { %v996_v5 = vpop.xlane.xlu0 %995 }
 0x4c6   : > { %3019 = vrcp.f32 %v996_v5 }
 0x4c7   : > { %v999_v7 = vpop.xlane.xlu1 %998 }
 0x4c8   : > { %3021 = vrcp.f32 %v999_v7 }
 0x4c9   : > { %v1118_v9 = vpop.xlane.xlu0 %1117 }
 0x4ca   : > { %3023 = vrcp.f32 %v1118_v9 }
 0x4cd   : > { %v1121_v11 = vpop.xlane.xlu1 %1120 }
 0x4ce   : > { %3025 = vrcp.f32 %v1121_v11 }
 0x4d0   : > { %v3020_v15 = vpop.eup %3019 }
 0x4d1   : > { %v1002_v18 = vmul.f32 %v3020_v15, %v3517_v60  ;;  %v1240_v60 = vpop.xlane.xlu0 %1239 }
 0x4d2   : > { %v3022_v16 = vpop.eup %3021  ;;  %3027 = vrcp.f32 %v1240_v60 }
 0x4d3   : > { %v1003_v19 = vmul.f32 %v3022_v16, %v3521_v0 }
 0x4d4   : > { %v3024_v22 = vpop.eup %3023 }
 0x4d5   : > { %v1004_v20 = vpack.c.bf16 %v1003_v19, %v1002_v18  ;;  %v1124_v25 = vmul.f32 %v3024_v22, %v3526_v1 }
 0x4d7   : > { %2785 = vmatmul.mubr.msk.bf16.vlgmr.msra.gmra.mrb[8].mxu0 %vm981_vm5, %v1004_v20 }
 0x4d8   : > { %v3026_v12 = vpop.eup %3025  ;;  %2795 = vmatpush3.bf16.msra.mxu0 %v3542_v10  ;;  %2796 = vmatprep.mubr.msk.bf16.mxu0 %vm3130_vm2, %v3129_v2  ;;  %v1362_v10 = vpop.xlane.xlu0 %1361 }
 0x4d9   : > { %v1125_v23 = vmul.f32 %v3026_v12, %v3530_v4  ;;  %2806 = vmatprep.subr.bf16.mxu0 %v3129_v2 }
 0x4db   : > { %v1126_v26 = vpack.c.bf16 %v1125_v23, %v1124_v25 }
 0x4dc   : > { %v3028_v29 = vpop.eup %3027  ;;  %v1512_v38 = vpop.permute.xlu0 %1511 }
 0x4dd   : > { %v1246_v30 = vmul.f32 %v3028_v29, %v3534_v63 }
 0x4df   : > { %2797 = vmatmul.mubr.msk.bf16.vlgmr.msra.gmra.mrb[12].mxu0 %vm981_vm5, %v1126_v26 }
 0x4e0   : > { %2807 = vmatpush3.bf16.msra.mxu0 %v1250_v3  ;;  %2808 = vmatprep.mubr.msk.bf16.mxu0 %vm3130_vm2, %v3129_v2 }
 0x4e1   : > { %2818 = vmatprep.subr.bf16.mxu0 %v3129_v2 }
 0x4fc   : > { %v1243_v0 = vpop.xlane.xlu1 %1242 }
 0x4fd   : > { %3029 = vrcp.f32 %v1243_v0 }
 0x500   : > { %v1365_v27 = vpop.xlane.xlu1 %1364 }
 0x501   : > { %3031 = vrcp.f32 %v1365_v27 }
 0x502   : > { %3033 = vrcp.f32 %v1362_v10 }
 0x504   : > { %v1502_v4 = vpop.xlane.xlu1 %1501 }
 0x507   : > { %v3030_v1 = vpop.eup %3029 }
 0x508   : > { %v1247_v32 = vmul.f32 %v3030_v1, %v3553_v41  ;;  %v1505_v33 = vpop.xlane.xlu1 %1504 }
 0x509   : > { %3035 = vrcp.f32 %v1505_v33 }
 0x50a   : > { %v1248_v34 = vpack.c.bf16 %v1247_v32, %v1246_v30  ;;  %3037 = vrcp.f32 %v1502_v4  ;;  %v1624_v41 = vpop.xlane.xlu0 %1623 }
 0x50b   : > { %v3032_v36 = vpop.eup %3031 }
 0x50c   : > { %v1627_v6 = vpop.xlane.xlu1 %1626  ;;  %2809 = vmatmul.mubr.msk.bf16.vlgmr.msra.gmra.mrb[16].mxu0 %vm981_vm5, %v1248_v34  ;;  %v3034_v40 = vpop.eup %3033  ;;  %v1369_v35 = vmul.f32 %v3032_v36, %v3558_v44 }
 0x50d   : > { %2819 = vmatpush3.bf16.msra.mxu0 %v1372_v58  ;;  %2820 = vmatprep.mubr.msk.bf16.mxu0 %vm3130_vm2, %v3129_v2  ;;  %v1368_v63 = vmul.f32 %v3034_v40, %v3538_v8  ;;  %3039 = vrcp.f32 %v1627_v6  ;;  %v2967_v6 = vld [vmem:[%s3284_s16] sm:$0xff]  }
 0x50e   : > { %2830 = vmatprep.subr.bf16.mxu0 %v3129_v2  ;;  %3041 = vrcp.f32 %v1624_v41  ;;  %2872 = vmatprep.subr.bf16.mxu1 %v2967_v6 }
 0x50f   : > { %v1370_v43 = vpack.c.bf16 %v1369_v35, %v1368_v63  ;;  %v2968_v35 = vld [vmem:[%s3284_s16 + $0x8] sm:$0xff]   ;;  %2873 = vmatpush3.bf16.msra.mxu1 %v2967_v6  ;;  %s3823_s16 = sld [smem:[#allocation15_spill]] (!%p2696_p6) }
 0x510   : > { %v1746_v39 = vpop.xlane.xlu1 %1745  ;;  %2874 = vmatprep.subr.bf16.mxu1 %v2968_v35 }
 0x513   : > { %v3036_v14 = vpop.eup %3035  ;;  %2875 = vmatpush3.bf16.msra.mxu1 %v2968_v35  ;;  %v2969_v35 = vld [vmem:[%s3301_s3] sm:$0xff]  }
 0x514   : > { %v1749_v37 = vpop.xlane.xlu1 %1748  ;;  %2821 = vmatmul.mubr.msk.bf16.vlgmr.msra.gmra.mrb[20].mxu0 %vm981_vm5, %v1370_v43  ;;  %v3038_v45 = vpop.eup %3037  ;;  %v1509_v44 = vmul.f32 %v3036_v14, %v3568_v52 }
 0x515   : > { %2831 = vmatpush3.bf16.msra.mxu0 %v1512_v38  ;;  %2832 = vmatprep.mubr.msk.bf16.mxu0 %vm3130_vm2, %v3129_v2  ;;  %v1508_v8 = vmul.f32 %v3038_v45, %v3563_v21  ;;  %3043 = vrcp.f32 %v1749_v37  ;;  %v1868_v52 = vpop.xlane.xlu0 %1867 }
 0x516   : > { %2842 = vmatprep.subr.bf16.mxu0 %v3129_v2  ;;  %3045 = vrcp.f32 %v1746_v39 }
 0x517   : > { %v1510_v17 = vpack.c.bf16 %v1509_v44, %v1508_v8  ;;  %v3040_v46 = vpop.eup %3039 }
 0x518   : > { %v1871_v28 = vpop.xlane.xlu1 %1870  ;;  %v3042_v50 = vpop.eup %3041  ;;  %v1631_v51 = vmul.f32 %v3040_v46, %v3574_v56 }
 0x519   : > { %v1630_v21 = vmul.f32 %v3042_v50, %v3570_v54  ;;  %3047 = vrcp.f32 %v1871_v28  ;;  %v1756_v57 = vpop.permute.xlu0 %1755 }
 0x51a   : > { %3049 = vrcp.f32 %v1868_v52 }
 0x51b   : > { %v1632_v24 = vpack.c.bf16 %v1631_v51, %v1630_v21 }
 0x51c   : > { %v1634_v49 = vpop.permute.xlu1 %1633  ;;  %2833 = vmatmul.mubr.msk.bf16.vlgmr.msra.gmra.mrb[24].mxu0 %vm981_vm5, %v1510_v17 }
 0x51d   : > { %2843 = vmatpush3.bf16.msra.mxu0 %v1634_v49  ;;  %2844 = vmatprep.mubr.msk.bf16.mxu0 %vm3130_vm2, %v3129_v2  ;;  %v1878_v62 = vpop.permute.xlu0 %1877 }
 0x51e   : > { %2854 = vmatprep.subr.bf16.mxu0 %v3129_v2 }
 0x51f   : > { %v3044_v55 = vpop.eup %3043 }
 0x520   : > { %v3046_v59 = vpop.eup %3045  ;;  %v1753_v42 = vmul.f32 %v3044_v55, %v3588_v48 }
 0x521   : > { %v1752_v56 = vmul.f32 %v3046_v59, %v3582_v13 }
 0x523   : > { %v1754_v61 = vpack.c.bf16 %v1753_v42, %v1752_v56  ;;  %v3048_v54 = vpop.eup %3047  ;;  %v2675_v56 = vld [vmem:[%s3821_s23] ss:$0 sm:$0xff] }
 0x524   : > { %2845 = vmatmul.mubr.msk.bf16.vlgmr.msra.gmra.mrb[28].mxu0 %vm981_vm5, %v1632_v24  ;;  %v3050_v53 = vpop.eup %3049  ;;  %v1875_v3 = vmul.f32 %v3048_v54, %v3592_v47 }
 0x525   : > { %2855 = vmatpush3.bf16.msra.mxu0 %v1756_v57  ;;  %2856 = vmatprep.mubr.msk.bf16.mxu0 %vm3130_vm2, %v3129_v2  ;;  %v1874_v58 = vmul.f32 %v3050_v53, %v3578_v31 }
 0x526   : > { %2866 = vmatprep.subr.bf16.mxu0 %v3129_v2 }
 0x527   : > { %v1876_v5 = vpack.c.bf16 %v1875_v3, %v1874_v58 }
 0x52c   : > { %2857 = vmatmul.mubr.msk.bf16.vlgmr.msra.gmra.mrb[32].mxu0 %vm981_vm5, %v1754_v61 }
 0x52d   : > { %2867 = vmatpush3.bf16.msra.mxu0 %v1878_v62  ;;  %2868 = vmatprep.mubr.msk.bf16.mxu0 %vm3130_vm2, %v3129_v2 }
 0x52e   : > { %2880 = vmatprep.subr.bf16.mxu0 %v2969_v35 }
 0x534   : > { %2869 = vmatmul.mubr.msk.bf16.vlgmr.msra.gmra.mrb[36].mxu0 %vm981_vm5, %v1876_v5  ;;  %v3067_v5 = vld [vmem:[#allocation2] sm:$0xff] }
 0x535   : > { %2881 = vmatpush3.bf16.msra.mxu0 %v2969_v35 }
 0x5aa   : > { %v1045_v48 = vpop.f32.mrb[8].mxu0 }
 0x5ab   : > { %v2786_v7 = vpop.f32.mrb[9].mxu0 }
 0x5ac   : > { %v1048_v13 = vpop.f32.mrb[10].mxu0 }
 0x5ad   : > { %v1052_v9 = vpack.c.bf16 %v1048_v13, %v1045_v48  ;;  %v2787_v11 = vpop.f32.mrb[11].mxu0  ;;  %v3068_v13 = vld [vmem:[#allocation2 + $0x10] sm:$0xff] }
 0x5b2   : > { %v1167_v15 = vpop.f32.mrb[12].mxu0 }
 0x5b3   : > { %v2798_v16 = vpop.f32.mrb[13].mxu0 }
 0x5b4   : > { %v1170_v18 = vpop.f32.mrb[14].mxu0 }
 0x5b5   : > { %v1174_v19 = vpack.c.bf16 %v1170_v18, %v1167_v15  ;;  %v2799_v20 = vpop.f32.mrb[15].mxu0  ;;  %v3069_v15 = vld [vmem:[#allocation2 + $0x8] sm:$0xff] }
 0x5b6   : > { %v3070_v20 = vld [vmem:[#allocation2 + $0x18] sm:$0xff] }
 0x5b7   : > { %1420 = vrot.lane.b32.xlu0 %v1174_v19, %s3142_s18 }
 0x5df   : > { %v1289_v2 = vpop.f32.mrb[16].mxu0 }
 0x5e0   : > { %v2810_v22 = vpop.f32.mrb[17].mxu0 }
 0x5e1   : > { %v1292_v47 = vpop.f32.mrb[18].mxu0 }
 0x5e2   : > { %v1296_v12 = vpack.c.bf16 %v1292_v47, %v1289_v2  ;;  %v2811_v31 = vpop.f32.mrb[19].mxu0 }
 0x5e4   : > { %1423 = vrot.lane.b32.xlu1 %v1296_v12, %s3143_s25 }
 0x5e7   : > { %v1411_v23 = vpop.f32.mrb[20].mxu0 }
 0x5e8   : > { %v2822_v25 = vpop.f32.mrb[21].mxu0 }
 0x5e9   : > { %v1414_v26 = vpop.f32.mrb[22].mxu0 }
 0x5ea   : > { %v1418_v60 = vpack.c.bf16 %v1414_v26, %v1411_v23  ;;  %v2823_v0 = vpop.f32.mrb[23].mxu0 }
 0x5ec   : > { %1426 = vrot.lane.b32.xlu1 %v1418_v60, %s3144_s21 }
 0x5ef   : > { %v1551_v10 = vpop.f32.mrb[24].mxu0 }
 0x5f0   : > { %v2834_v27 = vpop.f32.mrb[25].mxu0 }
 0x5f1   : > { %v1554_v4 = vpop.f32.mrb[26].mxu0 }
 0x5f2   : > { %v1558_v29 = vpack.c.bf16 %v1554_v4, %v1551_v10  ;;  %v2835_v1 = vpop.f32.mrb[27].mxu0 }
 0x5f7   : > { %v1673_v30 = vpop.f32.mrb[28].mxu0 }
 0x5f8   : > { %v2846_v32 = vpop.f32.mrb[29].mxu0 }
 0x5f9   : > { %v1676_v33 = vpop.f32.mrb[30].mxu0 }
 0x5fa   : > { %v1680_v34 = vpack.c.bf16 %v1676_v33, %v1673_v30  ;;  %v2847_v36 = vpop.f32.mrb[31].mxu0 }
 0x5fc   : > { %1926 = vrot.lane.b32.xlu0 %v1680_v34, %s3142_s18  ;;  %s3822_s18 = sld [smem:[#allocation14_spill]] (!%p2696_p6) }
 0x5ff   : > { %v1795_v38 = vpop.f32.mrb[32].mxu0 }
 0x600   : > { %v2858_v40 = vpop.f32.mrb[33].mxu0 }
 0x601   : > { %v1798_v63 = vpop.f32.mrb[34].mxu0 }
 0x602   : > { %v1802_v41 = vpack.c.bf16 %v1798_v63, %v1795_v38  ;;  %v2859_v39 = vpop.f32.mrb[35].mxu0  ;;  %v2970_v63 = vld [vmem:[%s3301_s3 + $0x8] sm:$0xff]   ;;  %s3824_s3 = sld [smem:[#allocation16_spill]] (!%p2696_p6) }
 0x603   : > { %2882 = vmatprep.subr.bf16.mxu0 %v2970_v63 }
 0x604   : > { %1929 = vrot.lane.b32.xlu0 %v1802_v41, %s3143_s25  ;;  %2883 = vmatpush3.bf16.msra.mxu0 %v2970_v63 }
 0x607   : > { %v1917_v43 = vpop.f32.mrb[36].mxu0 }
 0x608   : > { %v2870_v14 = vpop.f32.mrb[37].mxu0 }
 0x609   : > { %v1920_v37 = vpop.f32.mrb[38].mxu0 }
 0x60a   : > { %v1924_v45 = vpack.c.bf16 %v1920_v37, %v1917_v43  ;;  %v2871_v44 = vpop.f32.mrb[39].mxu0 }
 0x60c   : > { %1932 = vrot.lane.b32.xlu1 %v1924_v45, %s3144_s21 }
 0x629   : > { %v1421_v8 = vpop.permute.xlu0 %1420 }
 0x62a   : > { %v1430_v17 = vsel %vm933_vm3, %v1052_v9, %v1421_v8 }
 0x656   : > { %v1424_v28 = vpop.permute.xlu1 %1423 }
 0x657   : > { %v1432_v46 = vsel %vm981_vm5, %v1430_v17, %v1424_v28 }
 0x65e   : > { %v1427_v49 = vpop.permute.xlu1 %1426 }
 0x65f   : > { %v1435_v50 = vsel %vm1433_vm6, %v1432_v46, %v1427_v49 }
 0x660   : > { %1437 = vst.msk [vmem:[#allocation3] sm:$0xff] %vm774_vm1, %v1435_v50 }
 0x667   : > { %v1943_v51 = vld [vmem:[#allocation3] sm:$0xff] }
 0x668   : > { %2876 = vmatprep.mubr.msk.bf16.mxu1 %vm774_vm1, %v1943_v51  ;;  %v2680_v51 = vld [vmem:[%s729_s14] ss:$0 sm:$0xff] }
 0x66e   : > { %v1927_v52 = vpop.permute.xlu0 %1926 }
 0x66f   : > { %v1936_v24 = vsel %vm933_vm3, %v1558_v29, %v1927_v52 }
 0x676   : > { %v1930_v21 = vpop.permute.xlu0 %1929 }
 0x677   : > { %v1938_v55 = vsel %vm981_vm5, %v1936_v24, %v1930_v21 }
 0x67e   : > { %v1933_v57 = vpop.permute.xlu1 %1932 }
 0x67f   : > { %v1940_v59 = vsel %vm1433_vm6, %v1938_v55, %v1933_v57 }
 0x680   : > { %1942 = vst.msk [vmem:[#allocation3 + $0x8] sm:$0xff] %vm774_vm1, %v1940_v59  ;;  %v2681_v59 = vld [vmem:[%s732_s28] ss:$0 sm:$0xff] }
 0x687   : > { %v1944_v42 = vld [vmem:[#allocation3 + $0x8] sm:$0xff] }
 0x688   : > { %2877 = vmatmul.mubr.msk.bf16.vlgmr.msra.gmra.mrb[28].mxu1 %vm774_vm1, %v1944_v42 }
 0x75b   : > { %v2878_v61 = vpop.f32.mrb[28].mxu1 }
 0x75c   : > { %v2008_v54 = vpop.f32.mrb[29].mxu1  ;;  %v2017_v62 = vadd.f32 %v2878_v61, %v2675_v56 }
 0x75d   : > { %v2009_v53 = vadd.f32 %v2675_v56, %v2008_v54  ;;  %v2879_v3 = vpop.f32.mrb[30].mxu1 }
 0x75e   : > { %v2011_v58 = vpop.f32.mrb[31].mxu1  ;;  %v3664_v9 = vadd.f32 %v3068_v13, %v2017_v62  ;;  %v2020_v11 = vadd.f32 %v2879_v3, %v2675_v56 }
 0x75f   : > { %v3662_v48 = vadd.f32 %v3067_v5, %v2009_v53  ;;  %v2012_v7 = vadd.f32 %v2675_v56, %v2011_v58 }
 0x760   : > { %v3672_v2 = vadd.f32 %v3070_v20, %v2020_v11  ;;  %v2035_v22 = vsel %vm774_vm1, %v3664_v9, 0.0  ;;  %v2974_v20 = vld [vmem:[%s3311_s1 + $0x18] sm:$0xff]  }
 0x761   : > { %v3666_v16 = vadd.f32 %v3069_v15, %v2012_v7  ;;  %v2029_v18 = vsel %vm774_vm1, %v3662_v48, 0.0  ;;  %v2971_v15 = vld [vmem:[%s3311_s1] sm:$0xff]  }
 0x762   : > { %2030 = vadd.xlane.f32.xlu0 %v2029_v18  ;;  %v2038_v47 = vsel %vm774_vm1, %v3672_v2, 0.0  ;;  %2888 = vmatprep.subr.bf16.mxu1 %v2971_v15  ;;  %v2972_v18 = vld [vmem:[%s3311_s1 + $0x8] sm:$0xff]  }
 0x763   : > { %v2032_v19 = vsel %vm774_vm1, %v3666_v16, 0.0  ;;  %2889 = vmatpush3.bf16.msra.mxu1 %v2971_v15 }
 0x764   : > { %2033 = vadd.xlane.f32.xlu1 %v2032_v19  ;;  %2890 = vmatprep.subr.bf16.mxu1 %v2972_v18  ;;  %v2973_v19 = vld [vmem:[%s3311_s1 + $0x10] sm:$0xff]  }
 0x766   : > { %2036 = vadd.xlane.f32.xlu0 %v2035_v22  ;;  %v2975_v22 = vld [vmem:[%s3311_s1 + $0x20] sm:$0xff]  }
 0x767   : > { %2891 = vmatpush3.bf16.msra.mxu1 %v2972_v18 }
 0x768   : > { %2892 = vmatprep.subr.bf16.mxu1 %v2973_v19 }
 0x76a   : > { %2039 = vadd.xlane.f32.xlu0 %v2038_v47  ;;  %v2976_v47 = vld [vmem:[%s3311_s1 + $0x28] sm:$0xff]  }
 0x76b   : > { %2893 = vmatpush3.bf16.msra.mxu1 %v2973_v19 }
 0x76c   : > { %2894 = vmatprep.subr.bf16.mxu1 %v2974_v20 }
 0x76f   : > { %2895 = vmatpush3.bf16.msra.mxu1 %v2974_v20 }
 0x770   : > { %2896 = vmatprep.subr.bf16.mxu1 %v2975_v22 }
 0x773   : > { %2897 = vmatpush3.bf16.msra.mxu1 %v2975_v22 }
 0x774   : > { %2898 = vmatprep.subr.bf16.mxu1 %v2976_v47 }
 0x777   : > { %2899 = vmatpush3.bf16.msra.mxu1 %v2976_v47 }
 0x7ef   : > { %v2031_v12 = vpop.xlane.xlu0 %2030 }
 0x7f0   : > { %v2041_v31 = vmul.f32 0.03125, %v2031_v12  ;;  %v2977_v12 = vld [vmem:[%s3311_s1 + $0x30] sm:$0xff]  }
 0x7f1   : > { %v2034_v23 = vpop.xlane.xlu1 %2033  ;;  %2900 = vmatprep.subr.bf16.mxu1 %v2977_v12 }
 0x7f2   : > { %v2045_v25 = vsub.f32 %v3662_v48, %v2041_v31  ;;  %v2042_v26 = vmul.f32 0.03125, %v2034_v23  ;;  %v2978_v31 = vld [vmem:[%s3311_s1 + $0x38] sm:$0xff]   ;;  %2901 = vmatpush3.bf16.msra.mxu1 %v2977_v12  ;;  %v2682_v23 = vld [vmem:[%s740_s5] ss:$0 sm:$0xff] }
 0x7f3   : > { %v2037_v60 = vpop.xlane.xlu0 %2036  ;;  %2902 = vmatprep.subr.bf16.mxu1 %v2978_v31 }
 0x7f4   : > { %v2046_v0 = vsub.f32 %v3666_v16, %v2042_v26  ;;  %v2043_v10 = vmul.f32 0.03125, %v2037_v60  ;;  %v2049_v27 = vmul.f32 %v2045_v25, %v2045_v25 }
 0x7f6   : > { %v2047_v4 = vsub.f32 %v3664_v9, %v2043_v10  ;;  %v2053_v29 = vsel %vm774_vm1, %v2049_v27, 0.0  ;;  %v2050_v1 = vmul.f32 %v2046_v0, %v2046_v0  ;;  %2903 = vmatpush3.bf16.msra.mxu1 %v2978_v31 }
 0x7f7   : > { %2054 = vadd.xlane.f32.xlu0 %v2053_v29  ;;  %v2040_v30 = vpop.xlane.xlu0 %2039 }
 0x7f8   : > { %v2044_v32 = vmul.f32 0.03125, %v2040_v30  ;;  %v2056_v33 = vsel %vm774_vm1, %v2050_v1, 0.0  ;;  %v2051_v34 = vmul.f32 %v2047_v4, %v2047_v4 }
 0x7f9   : > { %2057 = vadd.xlane.f32.xlu1 %v2056_v33 }
 0x7fa   : > { %v2048_v36 = vsub.f32 %v3672_v2, %v2044_v32  ;;  %v2059_v38 = vsel %vm774_vm1, %v2051_v34, 0.0 }
 0x7fb   : > { %2060 = vadd.xlane.f32.xlu0 %v2059_v38 }
 0x7fc   : > { %v2052_v6 = vmul.f32 %v2048_v36, %v2048_v36 }
 0x7fe   : > { %v2062_v40 = vsel %vm774_vm1, %v2052_v6, 0.0 }
 0x7ff   : > { %2063 = vadd.xlane.f32.xlu1 %v2062_v40 }
 0x884   : > { %v2055_v41 = vpop.xlane.xlu0 %2054 }
 0x885   : > { %v2065_v39 = vmul.f32 0.03125, %v2055_v41 }
 0x886   : > { %v2058_v43 = vpop.xlane.xlu1 %2057 }
 0x887   : > { %v2069_v14 = vadd.f32 1e-05, %v2065_v39  ;;  %v2066_v37 = vmul.f32 0.03125, %v2058_v43 }
 0x888   : > { %v2061_v45 = vpop.xlane.xlu0 %2060 }
 0x889   : > { %3051 = vrsqrt.f32 %v2069_v14  ;;  %v2070_v44 = vadd.f32 1e-05, %v2066_v37  ;;  %v2067_v8 = vmul.f32 0.03125, %v2061_v45 }
 0x88b   : > { %3053 = vrsqrt.f32 %v2070_v44  ;;  %v2071_v28 = vadd.f32 1e-05, %v2067_v8 }
 0x88c   : > { %v2064_v17 = vpop.xlane.xlu1 %2063 }
 0x88d   : > { %3055 = vrsqrt.f32 %v2071_v28  ;;  %v2068_v46 = vmul.f32 0.03125, %v2064_v17 }
 0x88f   : > { %v2072_v49 = vadd.f32 1e-05, %v2068_v46 }
 0x891   : > { %3057 = vrsqrt.f32 %v2072_v49 }
 0x893   : > { %v3052_v50 = vpop.eup %3051 }
 0x894   : > { %v2077_v52 = vmul.f32 %v3052_v50, %v2045_v25 }
 0x895   : > { %v3054_v21 = vpop.eup %3053 }
 0x896   : > { %v2078_v24 = vmul.f32 %v3054_v21, %v2046_v0  ;;  %v2087_v55 = vmul.f32 %v2680_v51, %v2077_v52 }
 0x897   : > { %v3056_v57 = vpop.eup %3055 }
 0x898   : > { %v2079_v42 = vmul.f32 %v3056_v57, %v2047_v4  ;;  %v2088_v56 = vmul.f32 %v2680_v51, %v2078_v24  ;;  %v2097_v61 = vadd.f32 %v2681_v59, %v2087_v55 }
 0x89a   : > { %v2098_v54 = vadd.f32 %v2681_v59, %v2088_v56  ;;  %v2089_v53 = vmul.f32 %v2680_v51, %v2079_v42 }
 0x89b   : > { %v3058_v62 = vpop.eup %3057 }
 0x89c   : > { %v2080_v3 = vmul.f32 %v3058_v62, %v2048_v36  ;;  %v2101_v58 = vpack.c.bf16 %v2098_v54, %v2097_v61  ;;  %v2099_v7 = vadd.f32 %v2681_v59, %v2089_v53 }
 0x89e   : > { %v2090_v5 = vmul.f32 %v2680_v51, %v2080_v3  ;;  %2884 = vmatprep.mubr.msk.bf16.mxu0 %vm774_vm1, %v2101_v58  ;;  %v2687_v58 = vld [vmem:[%s748_s27] ss:$0 sm:$0xff] }
 0x8a0   : > { %v2100_v13 = vadd.f32 %v2681_v59, %v2090_v5 }
 0x8a2   : > { %v2102_v11 = vpack.c.bf16 %v2100_v13, %v2099_v7 }
 0x8a4   : > { %2885 = vmatmul.mubr.msk.bf16.vlgmr.msra.gmra.mrb[40].mxu0 %vm774_vm1, %v2102_v11 }
 0x977   : > { %v2886_v25 = vpop.f32.mrb[40].mxu0 }
 0x978   : > { %v2175_v26 = vadd.f32 %v2886_v25, %v2682_v23  ;;  %v2166_v60 = vpop.f32.mrb[41].mxu0 }
 0x979   : > { %v2167_v0 = vadd.f32 %v2682_v23, %v2166_v60  ;;  %v2887_v10 = vpop.f32.mrb[42].mxu0 }
 0x97a   : > { %v2187_v27 = vmul.f32 0.044715, %v2175_v26  ;;  %v2178_v4 = vadd.f32 %v2887_v10, %v2682_v23  ;;  %v2169_v29 = vpop.f32.mrb[43].mxu0  ;;  %v2183_v21 = vmul.f32 0.5, %v2175_v26  ;;  %v3145_v10 = vmov (!%p2696_p6), 0.0  }
 0x97b   : > { %v2185_v1 = vmul.f32 0.044715, %v2167_v0  ;;  %v2170_v30 = vadd.f32 %v2682_v23, %v2169_v29  ;;  %v2181_v57 = vmul.f32 0.5, %v2167_v0  ;;  %2908 = vmatprep.subr.bf16.mxu0 (!%p2696_p6), %v3145_v10  ;;  %2912 = vmatprep.mubr.msk.bf16.mxu0 (!%p2696_p6), %vm3146_vm9, %v3145_v10 }
 0x97c   : > { %v2191_v32 = vmul.f32 %v2187_v27, %v2175_v26  ;;  %v2188_v33 = vmul.f32 0.044715, %v2178_v4  ;;  %v2184_v24 = vmul.f32 0.5, %v2178_v4  ;;  %v3072_v27 = vld [vmem:[%s3795_s15 + $0x8] sm:$0xff] (!%p2696_p6)  }
 0x97d   : > { %v2189_v34 = vmul.f32 %v2185_v1, %v2167_v0  ;;  %v2186_v36 = vmul.f32 0.044715, %v2170_v30  ;;  %v2182_v59 = vmul.f32 0.5, %v2170_v30 }
 0x97e   : > { %v2195_v38 = vmul.f32 %v2191_v32, %v2175_v26  ;;  %v2192_v6 = vmul.f32 %v2188_v33, %v2178_v4  ;;  %v2697_v32 = vld [vmem:[%s3822_s18] ss:$0 sm:$0xff] (!%p2696_p6) }
 0x97f   : > { %v2193_v40 = vmul.f32 %v2189_v34, %v2167_v0  ;;  %v2190_v35 = vmul.f32 %v2186_v36, %v2170_v30  ;;  %v2698_v34 = vld [vmem:[%s3823_s16] ss:$0 sm:$0xff] (!%p2696_p6) }
 0x980   : > { %v2199_v63 = vadd.f32 %v2195_v38, %v2175_v26  ;;  %v2196_v41 = vmul.f32 %v2192_v6, %v2178_v4 }
 0x981   : > { %v2194_v39 = vmul.f32 %v2190_v35, %v2170_v30  ;;  %v2197_v43 = vadd.f32 %v2193_v40, %v2167_v0  ;;  %v2699_v40 = vld [vmem:[%s3824_s3] ss:$0 sm:$0xff] (!%p2696_p6) }
 0x982   : > { %v2203_v14 = vmul.f32 0.7978846, %v2199_v63  ;;  %v2200_v37 = vadd.f32 %v2196_v41, %v2178_v4 }
 0x983   : > { %v2198_v45 = vadd.f32 %v2194_v39, %v2170_v30  ;;  %v2201_v44 = vmul.f32 0.7978846, %v2197_v43 }
 0x984   : > { %3059 = vtanh.f32 %v2203_v14  ;;  %v2204_v8 = vmul.f32 0.7978846, %v2200_v37 }
 0x985   : > { %v2202_v28 = vmul.f32 0.7978846, %v2198_v45  ;;  %3061 = vtanh.f32 %v2201_v44 }
 0x986   : > { %3063 = vtanh.f32 %v2204_v8 }
 0x987   : > { %3065 = vtanh.f32 %v2202_v28 }
 0x98e   : > { %v3060_v17 = vpop.eup %3059 }
 0x98f   : > { %v3062_v46 = vpop.eup %3061  ;;  %v2211_v49 = vadd.f32 1.0, %v3060_v17 }
 0x990   : > { %v3064_v50 = vpop.eup %3063  ;;  %v2209_v51 = vadd.f32 1.0, %v3062_v46 }
 0x991   : > { %v3066_v52 = vpop.eup %3065  ;;  %v2212_v55 = vadd.f32 1.0, %v3064_v50  ;;  %v2215_v56 = vmul.f32 %v2211_v49, %v2183_v21 }
 0x992   : > { %v2210_v42 = vadd.f32 1.0, %v3066_v52  ;;  %v2213_v54 = vmul.f32 %v2209_v51, %v2181_v57 }
 0x993   : > { %v2216_v61 = vmul.f32 %v2212_v55, %v2184_v24 }
 0x994   : > { %v2214_v62 = vmul.f32 %v2210_v42, %v2182_v59 }
 0x995   : > { %v2218_v53 = vpack.c.bf16 %v2216_v61, %v2215_v56 }
 0x996   : > { %v2217_v3 = vpack.c.bf16 %v2214_v62, %v2213_v54 }
 0x998   : > { %2904 = vmatprep.mubr.bf16.mxu1 %v2217_v3 }
 0x999   : > { %2905 = vmatmul.mubr.bf16.vlgmr.msra.gmra.mrb[32].mxu1 %v2218_v53 }
 0xa6c   : > { %v2906_v5 = vpop.f32.mrb[32].mxu1 }
 0xa6d   : > { %v2333_v7 = vadd.f32 %v2906_v5, %v2687_v58  ;;  %v2324_v13 = vpop.f32.mrb[33].mxu1 }
 0xa6e   : > { %v2325_v11 = vadd.f32 %v2687_v58, %v2324_v13  ;;  %v2907_v15 = vpop.f32.mrb[34].mxu1  ;;  %2350 = sbr.rel (%p2696_p6) target bundleno = 3206 (0xc86), region = 96 }
 0xa6f   : > { %v2341_v18 = vadd.f32 %v2333_v7, %v3664_v9  ;;  %v2336_v19 = vadd.f32 %v2907_v15, %v2687_v58  ;;  %v2327_v20 = vpop.f32.mrb[35].mxu1 }
 0xa70   : > { %v2339_v22 = vadd.f32 %v2325_v11, %v3662_v48  ;;  %v2328_v47 = vadd.f32 %v2687_v58, %v2327_v20 }
 0xa71   : > { %2345 = vst.msk [vmem:[#allocation2 + $0x10] sm:$0xff] %vm774_vm1, %v2341_v18  ;;  %v2342_v12 = vadd.f32 %v2336_v19, %v3672_v2  ;;  %v2352_v9 = vrot.slane (!%p2696_p6), %v2341_v18, 7 }
 0xa72   : > { %2343 = vst.msk [vmem:[#allocation2] sm:$0xff] %vm774_vm1, %v2339_v22  ;;  %v2340_v31 = vadd.f32 %v2328_v47, %v3666_v16  ;;  %v3071_v16 = vld [vmem:[%s3795_s15] sm:$0xff] (!%p2696_p6)  }
 0xa73   : > { %2346 = vst.msk [vmem:[#allocation2 + $0x18] sm:$0xff] %vm774_vm1, %v2342_v12  ;;  %v2355_v48 = vsel (!%p2696_p6), %vm2354_vm7, %v2339_v22, %v2352_v9  ;;  %2909 = vmatpush3.bf16.msra.mxu0 (!%p2696_p6), %v3071_v16 }
 0xa74   : > { %2344 = vst.msk [vmem:[#allocation2 + $0x8] sm:$0xff] %vm774_vm1, %v2340_v31  ;;  %v2359_v23 = vsel (!%p2696_p6), %vm2358_vm8, %v2355_v48, 0.0  ;;  %2910 = vmatprep.subr.bf16.mxu0 (!%p2696_p6), %v3145_v10 }
 0xa75   : > { %2360 = vadd.xlane.f32.xlu0 %v2359_v23 }
 0xa77   : > { %2911 = vmatpush3.bf16.msra.mxu0 %v3072_v27 }
 0xb02   : > { %v2361_v25 = vpop.xlane.xlu0 %2360 }
 0xb03   : > { %v2362_v26 = vmul.f32 0.03125, %v2361_v25 }
 0xb05   : > { %v2363_v2 = vsub.f32 %v2355_v48, %v2362_v26 }
 0xb07   : > { %v2364_v60 = vmul.f32 %v2363_v2, %v2363_v2 }
 0xb09   : > { %v2365_v0 = vsel %vm2358_vm8, %v2364_v60, 0.0 }
 0xb0a   : > { %2366 = vadd.xlane.f32.xlu0 %v2365_v0 }
 0xb97   : > { %v2367_v4 = vpop.xlane.xlu0 %2366 }
 0xb98   : > { %v2368_v29 = vmul.f32 0.03125, %v2367_v4 }
 0xb9a   : > { %v2369_v1 = vadd.f32 1e-05, %v2368_v29 }
 0xb9c   : > { %3073 = vrsqrt.f32 %v2369_v1 }
 0xba6   : > { %v3074_v30 = vpop.eup %3073 }
 0xba7   : > { %v2371_v33 = vmul.f32 %v3074_v30, %v2363_v2 }
 0xba9   : > { %v2378_v36 = vmul.f32 %v2697_v32, %v2371_v33 }
 0xbab   : > { %v2385_v38 = vadd.f32 %v2698_v34, %v2378_v36 }
 0xbad   : > { %v2386_v6 = vpack.c.bf16 %v2385_v38, %v2385_v38 }
 0xbaf   : > { %2913 = vmatmul.mubr.msk.bf16.vlgmr.msra.gmra.mrb[0].mxu0 %vm774_vm1, %v2386_v6 }
 0xc82   : > { %v2447_v35 = vpop.f32.mrb[0].mxu0 }
 0xc83   : > { %v2448_v63 = vadd.f32 %v2699_v40, %v2447_v35  ;;  %v2914_v41 = vpop.f32.mrb[1].mxu0 }
 0xc84   : > { %v2450_v39 = vpop.f32.mrb[2].mxu0 }
 0xc85   : > { %2453 = vst [vmem:[#allocation4] sm:$0x3] %v2448_v63  ;;  %v2915_v43 = vpop.f32.mrb[3].mxu0 }
 0xc86 PF: > { %s3825_s22 = sld [smem:[#allocation8_spill]]  ;;  %s3147_s14 = smov [#allocation4]  }
 0xc87   : > { %s2463_s28 = sshll.u32 %s3147_s14, 4  ;;  %s2464_s28 = int_to_ptr.vmem [resolvable:$true] %s2463_s28 }
 0xc88   : > { %s3075_s5 = scalar_lea.vmem %s2464_s28, 32  ;;  %p3082_p11 = scmp.lt.s32.totalorder %s2464_s28, %s2464_s28 }
 0xc89   : > { %p3076_p8 = scmp.ne.s32.totalorder %s2464_s28, %s3075_s5  ;;  %p3083_p12 = scmp.lt.s32.totalorder %s3075_s5, %s3075_s5 }
 0xc8b   : > { %p3084_p13 = por %p3083_p12, %p3082_p11 }
 0xc8c   : > { %s3826_s30 = sadd.s32 4294967295, %s3825_s22  }
 0xc8d   : > { %p3745_p7 = scmp.eq.s32.totalorder %s3826_s30, 1 }
 0xc8f   : > { %p3077_p9 = pnand %p3076_p8, %p3745_p7 }
 0xc91   : > { %p3078_p10 = pneg %p3077_p9 }
 0xc93   : > { %p3085_p0 = pnand %p3084_p13, %p3078_p10 }
 0xc95   : > { %3088 = shalt.err (!%p3085_p0)
}
 0xc96   : > { %s3828_s27 = sld [smem:[#allocation17_spill]] }
 0xc9c   : > { %s3089_s24 = scalar_lea.hbm %s3828_s27, 32 }
 0xc9d   : > { %p3090_p1 = scmp.ne.s32.totalorder %s3828_s27, %s3089_s24  ;;  %p3095_p4 = scmp.lt.u32.totalorder %s3089_s24, %s3828_s27 }
 0xc9f   : > { %p3091_p2 = pnand %p3090_p1, %p3745_p7 }
 0xca1   : > { %p3092_p3 = pneg %p3091_p2 }
 0xca3   : > { %p3097_p5 = pnand %p3095_p4, %p3092_p3 }
 0xca5   : > { %3100 = shalt.err (!%p3097_p5)
}
 0xca6   : > { %2917 = dma.vmem_to_hbm [thread:$0]  (%p3745_p7), %s2464_s28, 32, %s3828_s27, [#allocation5]  }
 0xca7   : > { %3114 = dma.done.wait (%p3745_p7), [#allocation5], 32  }
 0xca8   : > { %3116 = vsyncadd (%p3745_p7), [#allocation5], 4294967264 }
 0xca9 PF: > { %s3829_s16 = sld [smem:[#allocation8_spill]]  ;;  %s3830_s24 = sld [smem:[#allocation7_spill]] }
 0xcaa   : > { %s3831_s25 = sld [smem:[#allocation9_spill]] }
 0xcaf   : > { %s28_s26 = sadd.s32 1, %s3829_s16  }
 0xcb0   : > { %p25_p6 = scmp.ge.s32.totalorder %s28_s26, 4  }
 0xcb2   :  { %27 = sbr.rel (!%p25_p6) target bundleno = 11 (0xb), region = 161 }
 0xcb9   :  { %2476 = vsyncpa [#allocation5], 1 }
 0xcba   :  { %2478 = vsyncpa [#allocation5 + $0x1], 1 }

</bundles_post_ra>
